<compile_context>
chip_gen: v7x
topology: tpu7x:2x2x1
jax: 0.10.0
libtpu: 0.0.40
codegen_flags: <defaults>
</compile_context>

<pallas_src>
import jax
import jax.numpy as jnp
from jax.experimental import pallas as pl
from jax.experimental.pallas import tpu as pltpu

# ----------------------------- config (small, synthetic) -----------------------------
VOCAB = 100
MAX_POS = 64
TYPE_VOCAB = 2
HIDDEN = 32
NUM_HEADS = 4
HEAD_DIM = HIDDEN // NUM_HEADS
INTERMEDIATE = 64
NUM_LAYERS = 2
NUM_TYPE = 3
LN_EPS = 1e-12
ATT_SCALE = 1.0 / (HEAD_DIM ** 0.5)

BATCH = 2
SEQ = 8
BS = BATCH * SEQ                      # batch folded into sublanes
STACK = NUM_HEADS * BS                # stacked-heads rows for attention (64)
OUT_LANES = 128                       # lane-dense output slab width

# On v6e/v7x set MXU_DTYPE = jnp.bfloat16 (weights + matmul operands only; all
# VPU/EUP math stays f32).  Default f32 keeps bit-close parity and suits v5e.
MXU_DTYPE = jnp.float32

# bias-pack row map: every small row parameter lives in ONE (BIAS_ROWS, 128) array.
ROW_EMB_LN_G = 0
ROW_EMB_LN_B = 1
ROW_LAYER0 = 2
(R_BQKV, R_BO, R_ALN_G, R_ALN_B, R_B1, R_B2, R_FLN_G, R_FLN_B) = range(8)
ROWS_PER_LAYER = 8
ROW_HEAD_B = ROW_LAYER0 + ROWS_PER_LAYER * NUM_LAYERS
BIAS_ROWS = ROW_HEAD_B + 1


# ----------------------------- fused whole-model kernel -----------------------------
def _gelu(x):
    # exact (erf) GELU, matching HF BERT default activation
    return 0.5 * x * (1.0 + jax.lax.erf(x * 0.7071067811865476))


def _bert_qa_kernel(emb_ref, mask_ref, bias_ref, wqkvo_ref, w1_ref, w2_ref,
                    headw_ref, out_ref):
    m = lambda t: t.astype(MXU_DTYPE)            # MXU-operand cast (no-op at f32)

    def ln_row(row):                             # (1, HIDDEN) LayerNorm param row
        return bias_ref[row:row + 1, :HIDDEN]

    def layernorm(v, g_row, b_row):
        mean = jnp.mean(v, axis=-1, keepdims=True)
        var = jnp.mean((v - mean) ** 2, axis=-1, keepdims=True)
        return (v - mean) * jax.lax.rsqrt(var + LN_EPS) * ln_row(g_row) + ln_row(b_row)

    x = emb_ref[...]                             # (BS, H) summed embeddings, batch folded
    mask = mask_ref[...]                         # (STACK, STACK) additive attention mask

    # embedding LayerNorm -> hidden_states[0]
    e0 = layernorm(x, ROW_EMB_LN_G, ROW_EMB_LN_B)
    hidden = e0

    for l in range(NUM_LAYERS):                  # static unroll (weights resident in VMEM)
        base = ROW_LAYER0 + l * ROWS_PER_LAYER
        wqkvo = wqkvo_ref[l]                     # (H, 4H): [Wq | Wk | Wv | Wo]

        # ---- fused QKV projection: one (BS,H) x (H,3H) matmul ----
        bqkv = bias_ref[base + R_BQKV: base + R_BQKV + 1, :3 * HIDDEN]
        qkv = jnp.dot(m(hidden), wqkvo[:, :3 * HIDDEN],
                      preferred_element_type=jnp.float32) + bqkv        # (BS, 3H)

        # ---- stacked-heads attention: 2 matmuls for ALL heads & batches ----
        # row index of the stacked layout: i = h*BS + b*SEQ + s  (head-major)
        def stack(offset):
            return jnp.concatenate(
                [qkv[:, offset + h * HEAD_DIM: offset + (h + 1) * HEAD_DIM]
                 for h in range(NUM_HEADS)], axis=0)                    # (STACK, d)

        q_st = stack(0)
        k_st = stack(HIDDEN)
        v_st = stack(2 * HIDDEN)

        s = jax.lax.dot_general(m(q_st), m(k_st), (((1,), (1,)), ((), ())),
                                preferred_element_type=jnp.float32)     # (STACK, STACK)
        s = s * ATT_SCALE + mask                 # off-(head,batch)-block entries -> -1e9
        s = s - jnp.max(s, axis=-1, keepdims=True)
        p = jnp.exp(s)
        p = p / jnp.sum(p, axis=-1, keepdims=True)        # exact normalization
        ctx_st = jnp.dot(m(p), m(v_st),
                         preferred_element_type=jnp.float32)            # (STACK, d)

        # ---- un-stacking folded into the output projection (no lane concat) ----
        wo = wqkvo[:, 3 * HIDDEN:]                                       # (H, H)
        attn_out = jnp.dot(m(ctx_st[0:BS]), wo[0:HEAD_DIM],
                           preferred_element_type=jnp.float32)
        for h in range(1, NUM_HEADS):
            attn_out += jnp.dot(m(ctx_st[h * BS:(h + 1) * BS]),
                                wo[h * HEAD_DIM:(h + 1) * HEAD_DIM],
                                preferred_element_type=jnp.float32)
        attn_out += bias_ref[base + R_BO: base + R_BO + 1, :HIDDEN]
        hidden = layernorm(hidden + attn_out, base + R_ALN_G, base + R_ALN_B)

        # ---- fused FFN: w1 + GELU + w2 + residual + LayerNorm ----
        inter = _gelu(jnp.dot(m(hidden), w1_ref[l],
                              preferred_element_type=jnp.float32)
                      + bias_ref[base + R_B1: base + R_B1 + 1, :INTERMEDIATE])
        ffn_out = (jnp.dot(m(inter), w2_ref[l],
                           preferred_element_type=jnp.float32)
                   + bias_ref[base + R_B2: base + R_B2 + 1, :HIDDEN])
        hidden = layernorm(hidden + ffn_out, base + R_FLN_G, base + R_FLN_B)

    # ---- heads, lane-dense: qa(final hidden) in lanes 0:2, type(e0) in lanes 2:5,
    #      summed 128-lane padded matmuls -> one unmasked full-width store ----
    out_ref[...] = (jnp.dot(m(hidden), headw_ref[0], preferred_element_type=jnp.float32)
                    + jnp.dot(m(e0), headw_ref[1], preferred_element_type=jnp.float32)
                    + bias_ref[ROW_HEAD_B: ROW_HEAD_B + 1, :])


def bert_for_qa_pallas(packed, emb2d, mask2d):
    """emb2d: (B*S, H) f32 summed embeddings; mask2d: (STACK, STACK) additive f32."""
    vmem = pl.BlockSpec(memory_space=pltpu.MemorySpace.VMEM)
    return pl.pallas_call(
        _bert_qa_kernel,
        out_shape=jax.ShapeDtypeStruct((BS, OUT_LANES), jnp.float32),
        in_specs=[vmem] * 7,          # single invocation, everything resident in VMEM
        out_specs=vmem,               # no grid -> no per-step overhead, one DMA/array
    )(emb2d, mask2d, packed["bias"], packed["wqkvo"], packed["w1"],
      packed["w2"], packed["head_w"])


# ----------------------------- parameter init & packing -----------------------------
def init_params(key):
    def nrm(k, shape, std=0.02):
        return (std * jax.random.normal(k, shape)).astype(jnp.float32)

    keys = iter(jax.random.split(key, 64 + 16 * NUM_LAYERS))
    p = {
        "word_emb": nrm(next(keys), (VOCAB, HIDDEN)),
        "pos_emb": nrm(next(keys), (MAX_POS, HIDDEN)),
        "tok_emb": nrm(next(keys), (TYPE_VOCAB, HIDDEN)),
        "emb_ln_g": jnp.ones((HIDDEN,), jnp.float32),
        "emb_ln_b": jnp.zeros((HIDDEN,), jnp.float32),
        "layers": [],
        "qa_w": nrm(next(keys), (HIDDEN, 2)),
        "qa_b": jnp.zeros((2,), jnp.float32),
        "type_w": nrm(next(keys), (HIDDEN, NUM_TYPE)),
        "type_b": jnp.zeros((NUM_TYPE,), jnp.float32),
    }
    for _ in range(NUM_LAYERS):
        layer = {
            "wq": nrm(next(keys), (HIDDEN, HIDDEN)), "bq": jnp.zeros((HIDDEN,), jnp.float32),
            "wk": nrm(next(keys), (HIDDEN, HIDDEN)), "bk": jnp.zeros((HIDDEN,), jnp.float32),
            "wv": nrm(next(keys), (HIDDEN, HIDDEN)), "bv": jnp.zeros((HIDDEN,), jnp.float32),
            "wo": nrm(next(keys), (HIDDEN, HIDDEN)), "bo": jnp.zeros((HIDDEN,), jnp.float32),
            "attn_ln_g": jnp.ones((HIDDEN,), jnp.float32),
            "attn_ln_b": jnp.zeros((HIDDEN,), jnp.float32),
            "w1": nrm(next(keys), (HIDDEN, INTERMEDIATE)),
            "b1": jnp.zeros((INTERMEDIATE,), jnp.float32),
            "w2": nrm(next(keys), (INTERMEDIATE, HIDDEN)),
            "b2": jnp.zeros((HIDDEN,), jnp.float32),
            "ffn_ln_g": jnp.ones((HIDDEN,), jnp.float32),
            "ffn_ln_b": jnp.zeros((HIDDEN,), jnp.float32),
        }
        p["layers"].append(layer)
    return p


def pack_params(p):
    """Pack weights into a few 128-lane-friendly slabs -> minimal DMA count."""
    def pad_row(vec, width=128):
        return jnp.zeros((width,), jnp.float32).at[: vec.shape[0]].set(vec)

    rows = [None] * BIAS_ROWS
    rows[ROW_EMB_LN_G] = pad_row(p["emb_ln_g"])
    rows[ROW_EMB_LN_B] = pad_row(p["emb_ln_b"])
    wqkvo, w1, w2 = [], [], []
    for l, lp in enumerate(p["layers"]):
        base = ROW_LAYER0 + l * ROWS_PER_LAYER
        rows[base + R_BQKV] = pad_row(jnp.concatenate([lp["bq"], lp["bk"], lp["bv"]]))
        rows[base + R_BO] = pad_row(lp["bo"])
        rows[base + R_ALN_G] = pad_row(lp["attn_ln_g"])
        rows[base + R_ALN_B] = pad_row(lp["attn_ln_b"])
        rows[base + R_B1] = pad_row(lp["b1"])
        rows[base + R_B2] = pad_row(lp["b2"])
        rows[base + R_FLN_G] = pad_row(lp["ffn_ln_g"])
        rows[base + R_FLN_B] = pad_row(lp["ffn_ln_b"])
        wqkvo.append(jnp.concatenate([lp["wq"], lp["wk"], lp["wv"], lp["wo"]], axis=1))
        w1.append(lp["w1"])
        w2.append(lp["w2"])
    head_bias = (jnp.zeros((128,), jnp.float32)
                 .at[0:2].set(p["qa_b"])
                 .at[2:2 + NUM_TYPE].set(p["type_b"]))
    rows[ROW_HEAD_B] = head_bias

    head_w = jnp.zeros((2, HIDDEN, 128), jnp.float32)
    head_w = head_w.at[0, :, 0:2].set(p["qa_w"])                 # QA head (final hidden)
    head_w = head_w.at[1, :, 2:2 + NUM_TYPE].set(p["type_w"])    # type head (e0)

    return {
        "bias": jnp.stack(rows),                                 # (BIAS_ROWS, 128) f32
        "wqkvo": jnp.stack(wqkvo).astype(MXU_DTYPE),             # (L, H, 4H) = (L, 32, 128)
        "w1": jnp.stack(w1).astype(MXU_DTYPE),                   # (L, H, I)
        "w2": jnp.stack(w2).astype(MXU_DTYPE),                   # (L, I, H)
        "head_w": head_w.astype(MXU_DTYPE),                      # (2, H, 128)
    }


# ----------------------------- forward (Pallas) -----------------------------
def bert_for_qa_forward(params, packed, input_ids, token_type_ids, attention_mask):
    B, S = input_ids.shape
    # embedding-table gathers stay as JAX glue (data-dependent gather)
    emb = (params["word_emb"][input_ids]
           + params["pos_emb"][jnp.arange(S)][None, :, :]
           + params["tok_emb"][token_type_ids]).astype(jnp.float32)     # (B, S, H)
    emb2d = emb.reshape(B * S, HIDDEN)

    # additive mask for the stacked-heads (head-major) layout: index i = h*(B*S)+b*S+s.
    # Allow only same (head, batch) blocks; add key-padding mask on the column position.
    idx = jnp.arange(NUM_HEADS * B * S)
    h_i = idx // (B * S)
    b_i = (idx % (B * S)) // S
    s_i = idx % S
    allowed = (h_i[:, None] == h_i[None, :]) & (b_i[:, None] == b_i[None, :])
    pad = (1.0 - attention_mask.astype(jnp.float32)) * -10000.0          # (B, S)
    mask2d = (jnp.where(allowed, 0.0, -1e9)
              + pad[b_i, s_i][None, :]).astype(jnp.float32)              # (STACK, STACK)

    slab = bert_for_qa_pallas(packed, emb2d, mask2d).reshape(B, S, OUT_LANES)
    # TODO(synk): 'loss' branch requires start/end position labels; not supplied here,
    # matching the PyTorch module when outputs has no 'loss' key.
    return {"start_logits": slab[..., 0],                  # (B, S)
            "end_logits": slab[..., 1],                    # (B, S)
            "type_logits": slab[:, 0, 2:2 + NUM_TYPE]}     # (B, NUM_TYPE), CLS row of e0


# ----------------------------- pure-JAX reference (verification) -----------------------------
def _ln_ref(x, g, b, eps=LN_EPS):
    mean = jnp.mean(x, axis=-1, keepdims=True)
    var = jnp.mean((x - mean) ** 2, axis=-1, keepdims=True)
    return (x - mean) * jax.lax.rsqrt(var + eps) * g + b


def bert_for_qa_ref(params, input_ids, token_type_ids, attention_mask):
    B, S = input_ids.shape
    emb = (params["word_emb"][input_ids]
           + params["pos_emb"][jnp.arange(S)][None, :, :]
           + params["tok_emb"][token_type_ids])
    e0 = _ln_ref(emb, params["emb_ln_g"], params["emb_ln_b"])
    hidden = e0
    add_mask = ((1.0 - attention_mask.astype(jnp.float32)) * -10000.0)[:, None, None, :]

    for lp in params["layers"]:
        q = hidden @ lp["wq"] + lp["bq"]
        k = hidden @ lp["wk"] + lp["bk"]
        v = hidden @ lp["wv"] + lp["bv"]

        def heads(x):
            return x.reshape(B, S, NUM_HEADS, HEAD_DIM).transpose(0, 2, 1, 3)

        s = jnp.einsum("bhqd,bhkd->bhqk", heads(q), heads(k)) * ATT_SCALE + add_mask
        p = jax.nn.softmax(s, axis=-1)
        ctx = jnp.einsum("bhqk,bhkd->bhqd", p, heads(v))
        ctx = ctx.transpose(0, 2, 1, 3).reshape(B, S, HIDDEN)
        attn_out = ctx @ lp["wo"] + lp["bo"]
        hidden = _ln_ref(hidden + attn_out, lp["attn_ln_g"], lp["attn_ln_b"])

        inter = hidden @ lp["w1"] + lp["b1"]
        inter = 0.5 * inter * (1.0 + jax.lax.erf(inter * 0.7071067811865476))
        ffn_out = inter @ lp["w2"] + lp["b2"]
        hidden = _ln_ref(hidden + ffn_out, lp["ffn_ln_g"], lp["ffn_ln_b"])

    qa = hidden @ params["qa_w"] + params["qa_b"]
    return {"start_logits": qa[..., 0],
            "end_logits": qa[..., 1],
            "type_logits": e0[:, 0, :] @ params["type_w"] + params["type_b"]}


# ----------------------------- main -----------------------------
if __name__ == "__main__":
    key = jax.random.PRNGKey(0)
    k_param, k_ids, k_tok = jax.random.split(key, 3)

    params = init_params(k_param)
    packed = pack_params(params)

    input_ids = jax.random.randint(k_ids, (BATCH, SEQ), 0, VOCAB, dtype=jnp.int32)
    token_type_ids = jax.random.randint(k_tok, (BATCH, SEQ), 0, TYPE_VOCAB, dtype=jnp.int32)
    attention_mask = jnp.ones((BATCH, SEQ), dtype=jnp.int32)

    out = bert_for_qa_forward(params, packed, input_ids, token_type_ids, attention_mask)
    out = jax.block_until_ready(out)

    ref = bert_for_qa_ref(params, input_ids, token_type_ids, attention_mask)
    ref = jax.block_until_ready(ref)

    assert out["start_logits"].shape == (BATCH, SEQ)
    assert out["end_logits"].shape == (BATCH, SEQ)
    assert out["type_logits"].shape == (BATCH, NUM_TYPE)
    for name in ("start_logits", "end_logits", "type_logits"):
        assert jnp.allclose(out[name], ref[name], atol=2e-3, rtol=2e-3), name

    print("KERNEL_OK")
</pallas_src>

<mosaic_0001>
module attributes {stable_mosaic.version = 11 : i64} {
  func.func @_bert_qa_kernel(%arg0: memref<16x32xf32, #tpu.memory_space<vmem>>, %arg1: memref<64x64xf32, #tpu.memory_space<vmem>>, %arg2: memref<19x128xf32, #tpu.memory_space<vmem>>, %arg3: memref<2x32x128xf32, #tpu.memory_space<vmem>>, %arg4: memref<2x32x64xf32, #tpu.memory_space<vmem>>, %arg5: memref<2x64x32xf32, #tpu.memory_space<vmem>>, %arg6: memref<2x32x128xf32, #tpu.memory_space<vmem>>, %arg7: memref<16x128xf32, #tpu.memory_space<vmem>>) attributes {dimension_semantics = [], scalar_prefetch = 0 : i64, scratch_operands = 0 : i64, tpu.core_type = #tpu.core_type<tc>} {
    %c0 = arith.constant 0 : index
    %c0_0 = arith.constant 0 : index
    %0 = vector.load %arg0[%c0, %c0_0] : memref<16x32xf32, #tpu.memory_space<vmem>>, vector<16x32xf32>
    %c0_1 = arith.constant 0 : index
    %c0_2 = arith.constant 0 : index
    %1 = vector.load %arg1[%c0_1, %c0_2] : memref<64x64xf32, #tpu.memory_space<vmem>>, vector<64x64xf32>
    %cst = arith.constant dense<0.000000e+00> : vector<16xf32>
    %2 = vector.multi_reduction <add>, %0, %cst [1] : vector<16x32xf32> to vector<16xf32>
    %3 = vector.shape_cast %2 : vector<16xf32> to vector<16x1xf32>
    %cst_3 = arith.constant 3.200000e+01 : f32
    %4 = vector.broadcast %cst_3 : f32 to vector<16x1xf32>
    %5 = arith.divf %3, %4 : vector<16x1xf32>
    %6 = vector.broadcast %5 : vector<16x1xf32> to vector<16x32xf32>
    %7 = arith.subf %0, %6 : vector<16x32xf32>
    %8 = arith.mulf %7, %7 : vector<16x32xf32>
    %cst_4 = arith.constant dense<0.000000e+00> : vector<16xf32>
    %9 = vector.multi_reduction <add>, %8, %cst_4 [1] : vector<16x32xf32> to vector<16xf32>
    %10 = vector.shape_cast %9 : vector<16xf32> to vector<16x1xf32>
    %cst_5 = arith.constant 3.200000e+01 : f32
    %11 = vector.broadcast %cst_5 : f32 to vector<16x1xf32>
    %12 = arith.divf %10, %11 : vector<16x1xf32>
    %13 = vector.broadcast %5 : vector<16x1xf32> to vector<16x32xf32>
    %14 = arith.subf %0, %13 : vector<16x32xf32>
    %cst_6 = arith.constant 9.99999996E-13 : f32
    %15 = vector.broadcast %cst_6 : f32 to vector<16x1xf32>
    %16 = arith.addf %12, %15 : vector<16x1xf32>
    %17 = math.rsqrt %16 : vector<16x1xf32>
    %18 = vector.broadcast %17 : vector<16x1xf32> to vector<16x32xf32>
    %19 = arith.mulf %14, %18 : vector<16x32xf32>
    %c0_7 = arith.constant 0 : index
    %c0_8 = arith.constant 0 : index
    %20 = vector.load %arg2[%c0_7, %c0_8] : memref<19x128xf32, #tpu.memory_space<vmem>>, vector<1x32xf32>
    %21 = vector.broadcast %20 : vector<1x32xf32> to vector<16x32xf32>
    %22 = arith.mulf %19, %21 : vector<16x32xf32>
    %c1 = arith.constant 1 : index
    %c0_9 = arith.constant 0 : index
    %23 = vector.load %arg2[%c1, %c0_9] : memref<19x128xf32, #tpu.memory_space<vmem>>, vector<1x32xf32>
    %24 = vector.broadcast %23 : vector<1x32xf32> to vector<16x32xf32>
    %25 = arith.addf %22, %24 : vector<16x32xf32>
    %c0_10 = arith.constant 0 : index
    %c0_11 = arith.constant 0 : index
    %c0_12 = arith.constant 0 : index
    %26 = vector.load %arg3[%c0_10, %c0_11, %c0_12] : memref<2x32x128xf32, #tpu.memory_space<vmem>>, vector<1x32x128xf32>
    %27 = vector.shape_cast %26 : vector<1x32x128xf32> to vector<32x128xf32>
    %c2 = arith.constant 2 : index
    %c0_13 = arith.constant 0 : index
    %28 = vector.load %arg2[%c2, %c0_13] : memref<19x128xf32, #tpu.memory_space<vmem>>, vector<1x96xf32>
    %29 = vector.extract_strided_slice %27 {offsets = [0, 0], sizes = [32, 96], strides = [1, 1]} : vector<32x128xf32> to vector<32x96xf32>
    %cst_14 = arith.constant dense<0.000000e+00> : vector<16x96xf32>
    %30 = tpu.matmul %25, %29, %cst_14 {dimension_numbers = #tpu.dot_dimension_numbers<[1], [0], [0], [1], [0, 0, 1, 1], [], []>} : vector<16x32xf32>, vector<32x96xf32>, vector<16x96xf32> -> vector<16x96xf32>
    %31 = vector.broadcast %28 : vector<1x96xf32> to vector<16x96xf32>
    %32 = arith.addf %30, %31 : vector<16x96xf32>
    %33 = vector.extract_strided_slice %32 {offsets = [0, 0], sizes = [16, 8], strides = [1, 1]} : vector<16x96xf32> to vector<16x8xf32>
    %34 = vector.extract_strided_slice %32 {offsets = [0, 8], sizes = [16, 8], strides = [1, 1]} : vector<16x96xf32> to vector<16x8xf32>
    %35 = vector.extract_strided_slice %32 {offsets = [0, 16], sizes = [16, 8], strides = [1, 1]} : vector<16x96xf32> to vector<16x8xf32>
    %36 = vector.extract_strided_slice %32 {offsets = [0, 24], sizes = [16, 8], strides = [1, 1]} : vector<16x96xf32> to vector<16x8xf32>
    %37 = tpu.concatenate %33, %34, %35, %36 in 0 : vector<16x8xf32>, vector<16x8xf32>, vector<16x8xf32>, vector<16x8xf32> -> vector<64x8xf32>
    %38 = vector.extract_strided_slice %32 {offsets = [0, 32], sizes = [16, 8], strides = [1, 1]} : vector<16x96xf32> to vector<16x8xf32>
    %39 = vector.extract_strided_slice %32 {offsets = [0, 40], sizes = [16, 8], strides = [1, 1]} : vector<16x96xf32> to vector<16x8xf32>
    %40 = vector.extract_strided_slice %32 {offsets = [0, 48], sizes = [16, 8], strides = [1, 1]} : vector<16x96xf32> to vector<16x8xf32>
    %41 = vector.extract_strided_slice %32 {offsets = [0, 56], sizes = [16, 8], strides = [1, 1]} : vector<16x96xf32> to vector<16x8xf32>
    %42 = tpu.concatenate %38, %39, %40, %41 in 0 : vector<16x8xf32>, vector<16x8xf32>, vector<16x8xf32>, vector<16x8xf32> -> vector<64x8xf32>
    %43 = vector.extract_strided_slice %32 {offsets = [0, 64], sizes = [16, 8], strides = [1, 1]} : vector<16x96xf32> to vector<16x8xf32>
    %44 = vector.extract_strided_slice %32 {offsets = [0, 72], sizes = [16, 8], strides = [1, 1]} : vector<16x96xf32> to vector<16x8xf32>
    %45 = vector.extract_strided_slice %32 {offsets = [0, 80], sizes = [16, 8], strides = [1, 1]} : vector<16x96xf32> to vector<16x8xf32>
    %46 = vector.extract_strided_slice %32 {offsets = [0, 88], sizes = [16, 8], strides = [1, 1]} : vector<16x96xf32> to vector<16x8xf32>
    %47 = tpu.concatenate %43, %44, %45, %46 in 0 : vector<16x8xf32>, vector<16x8xf32>, vector<16x8xf32>, vector<16x8xf32> -> vector<64x8xf32>
    %cst_15 = arith.constant dense<0.000000e+00> : vector<64x64xf32>
    %48 = tpu.matmul %37, %42, %cst_15 {dimension_numbers = #tpu.dot_dimension_numbers<[1], [1], [0], [0], [0, 0, 1, 0], [], []>} : vector<64x8xf32>, vector<64x8xf32>, vector<64x64xf32> -> vector<64x64xf32>
    %cst_16 = arith.constant 0.353553385 : f32
    %49 = vector.broadcast %cst_16 : f32 to vector<64x64xf32>
    %50 = arith.mulf %48, %49 : vector<64x64xf32>
    %51 = arith.addf %50, %1 : vector<64x64xf32>
    %cst_17 = arith.constant dense<0xFF800000> : vector<64xf32>
    %52 = vector.multi_reduction <maximumf>, %51, %cst_17 [1] : vector<64x64xf32> to vector<64xf32>
    %53 = vector.shape_cast %52 : vector<64xf32> to vector<64x1xf32>
    %54 = vector.broadcast %53 : vector<64x1xf32> to vector<64x64xf32>
    %55 = arith.subf %51, %54 : vector<64x64xf32>
    %56 = math.exp %55 : vector<64x64xf32>
    %cst_18 = arith.constant dense<0.000000e+00> : vector<64xf32>
    %57 = vector.multi_reduction <add>, %56, %cst_18 [1] : vector<64x64xf32> to vector<64xf32>
    %58 = vector.shape_cast %57 : vector<64xf32> to vector<64x1xf32>
    %59 = vector.broadcast %58 : vector<64x1xf32> to vector<64x64xf32>
    %60 = arith.divf %56, %59 : vector<64x64xf32>
    %cst_19 = arith.constant dense<0.000000e+00> : vector<64x8xf32>
    %61 = tpu.matmul %60, %47, %cst_19 {dimension_numbers = #tpu.dot_dimension_numbers<[1], [0], [0], [1], [0, 0, 1, 1], [], []>} : vector<64x64xf32>, vector<64x8xf32>, vector<64x8xf32> -> vector<64x8xf32>
    %62 = vector.extract_strided_slice %27 {offsets = [0, 96], sizes = [32, 32], strides = [1, 1]} : vector<32x128xf32> to vector<32x32xf32>
    %63 = vector.extract_strided_slice %61 {offsets = [0, 0], sizes = [16, 8], strides = [1, 1]} : vector<64x8xf32> to vector<16x8xf32>
    %64 = vector.extract_strided_slice %62 {offsets = [0, 0], sizes = [8, 32], strides = [1, 1]} : vector<32x32xf32> to vector<8x32xf32>
    %cst_20 = arith.constant dense<0.000000e+00> : vector<16x32xf32>
    %65 = tpu.matmul %63, %64, %cst_20 {dimension_numbers = #tpu.dot_dimension_numbers<[1], [0], [0], [1], [0, 0, 1, 1], [], []>} : vector<16x8xf32>, vector<8x32xf32>, vector<16x32xf32> -> vector<16x32xf32>
    %66 = vector.extract_strided_slice %61 {offsets = [16, 0], sizes = [16, 8], strides = [1, 1]} : vector<64x8xf32> to vector<16x8xf32>
    %67 = vector.extract_strided_slice %62 {offsets = [8, 0], sizes = [8, 32], strides = [1, 1]} : vector<32x32xf32> to vector<8x32xf32>
    %cst_21 = arith.constant dense<0.000000e+00> : vector<16x32xf32>
    %68 = tpu.matmul %66, %67, %cst_21 {dimension_numbers = #tpu.dot_dimension_numbers<[1], [0], [0], [1], [0, 0, 1, 1], [], []>} : vector<16x8xf32>, vector<8x32xf32>, vector<16x32xf32> -> vector<16x32xf32>
    %69 = arith.addf %65, %68 : vector<16x32xf32>
    %70 = vector.extract_strided_slice %61 {offsets = [32, 0], sizes = [16, 8], strides = [1, 1]} : vector<64x8xf32> to vector<16x8xf32>
    %71 = vector.extract_strided_slice %62 {offsets = [16, 0], sizes = [8, 32], strides = [1, 1]} : vector<32x32xf32> to vector<8x32xf32>
    %cst_22 = arith.constant dense<0.000000e+00> : vector<16x32xf32>
    %72 = tpu.matmul %70, %71, %cst_22 {dimension_numbers = #tpu.dot_dimension_numbers<[1], [0], [0], [1], [0, 0, 1, 1], [], []>} : vector<16x8xf32>, vector<8x32xf32>, vector<16x32xf32> -> vector<16x32xf32>
    %73 = arith.addf %69, %72 : vector<16x32xf32>
    %74 = vector.extract_strided_slice %61 {offsets = [48, 0], sizes = [16, 8], strides = [1, 1]} : vector<64x8xf32> to vector<16x8xf32>
    %75 = vector.extract_strided_slice %62 {offsets = [24, 0], sizes = [8, 32], strides = [1, 1]} : vector<32x32xf32> to vector<8x32xf32>
    %cst_23 = arith.constant dense<0.000000e+00> : vector<16x32xf32>
    %76 = tpu.matmul %74, %75, %cst_23 {dimension_numbers = #tpu.dot_dimension_numbers<[1], [0], [0], [1], [0, 0, 1, 1], [], []>} : vector<16x8xf32>, vector<8x32xf32>, vector<16x32xf32> -> vector<16x32xf32>
    %77 = arith.addf %73, %76 : vector<16x32xf32>
    %c3 = arith.constant 3 : index
    %c0_24 = arith.constant 0 : index
    %78 = vector.load %arg2[%c3, %c0_24] : memref<19x128xf32, #tpu.memory_space<vmem>>, vector<1x32xf32>
    %79 = vector.broadcast %78 : vector<1x32xf32> to vector<16x32xf32>
    %80 = arith.addf %77, %79 : vector<16x32xf32>
    %81 = arith.addf %25, %80 : vector<16x32xf32>
    %cst_25 = arith.constant dense<0.000000e+00> : vector<16xf32>
    %82 = vector.multi_reduction <add>, %81, %cst_25 [1] : vector<16x32xf32> to vector<16xf32>
    %83 = vector.shape_cast %82 : vector<16xf32> to vector<16x1xf32>
    %cst_26 = arith.constant 3.200000e+01 : f32
    %84 = vector.broadcast %cst_26 : f32 to vector<16x1xf32>
    %85 = arith.divf %83, %84 : vector<16x1xf32>
    %86 = vector.broadcast %85 : vector<16x1xf32> to vector<16x32xf32>
    %87 = arith.subf %81, %86 : vector<16x32xf32>
    %88 = arith.mulf %87, %87 : vector<16x32xf32>
    %cst_27 = arith.constant dense<0.000000e+00> : vector<16xf32>
    %89 = vector.multi_reduction <add>, %88, %cst_27 [1] : vector<16x32xf32> to vector<16xf32>
    %90 = vector.shape_cast %89 : vector<16xf32> to vector<16x1xf32>
    %cst_28 = arith.constant 3.200000e+01 : f32
    %91 = vector.broadcast %cst_28 : f32 to vector<16x1xf32>
    %92 = arith.divf %90, %91 : vector<16x1xf32>
    %93 = vector.broadcast %85 : vector<16x1xf32> to vector<16x32xf32>
    %94 = arith.subf %81, %93 : vector<16x32xf32>
    %cst_29 = arith.constant 9.99999996E-13 : f32
    %95 = vector.broadcast %cst_29 : f32 to vector<16x1xf32>
    %96 = arith.addf %92, %95 : vector<16x1xf32>
    %97 = math.rsqrt %96 : vector<16x1xf32>
    %98 = vector.broadcast %97 : vector<16x1xf32> to vector<16x32xf32>
    %99 = arith.mulf %94, %98 : vector<16x32xf32>
    %c4 = arith.constant 4 : index
    %c0_30 = arith.constant 0 : index
    %100 = vector.load %arg2[%c4, %c0_30] : memref<19x128xf32, #tpu.memory_space<vmem>>, vector<1x32xf32>
    %101 = vector.broadcast %100 : vector<1x32xf32> to vector<16x32xf32>
    %102 = arith.mulf %99, %101 : vector<16x32xf32>
    %c5 = arith.constant 5 : index
    %c0_31 = arith.constant 0 : index
    %103 = vector.load %arg2[%c5, %c0_31] : memref<19x128xf32, #tpu.memory_space<vmem>>, vector<1x32xf32>
    %104 = vector.broadcast %103 : vector<1x32xf32> to vector<16x32xf32>
    %105 = arith.addf %102, %104 : vector<16x32xf32>
    %c0_32 = arith.constant 0 : index
    %c0_33 = arith.constant 0 : index
    %c0_34 = arith.constant 0 : index
    %106 = vector.load %arg4[%c0_32, %c0_33, %c0_34] : memref<2x32x64xf32, #tpu.memory_space<vmem>>, vector<1x32x64xf32>
    %107 = vector.shape_cast %106 : vector<1x32x64xf32> to vector<32x64xf32>
    %cst_35 = arith.constant dense<0.000000e+00> : vector<16x64xf32>
    %108 = tpu.matmul %105, %107, %cst_35 {dimension_numbers = #tpu.dot_dimension_numbers<[1], [0], [0], [1], [0, 0, 1, 1], [], []>} : vector<16x32xf32>, vector<32x64xf32>, vector<16x64xf32> -> vector<16x64xf32>
    %c6 = arith.constant 6 : index
    %c0_36 = arith.constant 0 : index
    %109 = vector.load %arg2[%c6, %c0_36] : memref<19x128xf32, #tpu.memory_space<vmem>>, vector<1x64xf32>
    %110 = vector.broadcast %109 : vector<1x64xf32> to vector<16x64xf32>
    %111 = arith.addf %108, %110 : vector<16x64xf32>
    %cst_37 = arith.constant 5.000000e-01 : f32
    %112 = vector.broadcast %cst_37 : f32 to vector<16x64xf32>
    %113 = arith.mulf %112, %111 : vector<16x64xf32>
    %cst_38 = arith.constant 0.707106769 : f32
    %114 = vector.broadcast %cst_38 : f32 to vector<16x64xf32>
    %115 = arith.mulf %111, %114 : vector<16x64xf32>
    %116 = math.erf %115 : vector<16x64xf32>
    %cst_39 = arith.constant 1.000000e+00 : f32
    %117 = vector.broadcast %cst_39 : f32 to vector<16x64xf32>
    %118 = arith.addf %117, %116 : vector<16x64xf32>
    %119 = arith.mulf %113, %118 : vector<16x64xf32>
    %c0_40 = arith.constant 0 : index
    %c0_41 = arith.constant 0 : index
    %c0_42 = arith.constant 0 : index
    %120 = vector.load %arg5[%c0_40, %c0_41, %c0_42] : memref<2x64x32xf32, #tpu.memory_space<vmem>>, vector<1x64x32xf32>
    %121 = vector.shape_cast %120 : vector<1x64x32xf32> to vector<64x32xf32>
    %cst_43 = arith.constant dense<0.000000e+00> : vector<16x32xf32>
    %122 = tpu.matmul %119, %121, %cst_43 {dimension_numbers = #tpu.dot_dimension_numbers<[1], [0], [0], [1], [0, 0, 1, 1], [], []>} : vector<16x64xf32>, vector<64x32xf32>, vector<16x32xf32> -> vector<16x32xf32>
    %c7 = arith.constant 7 : index
    %c0_44 = arith.constant 0 : index
    %123 = vector.load %arg2[%c7, %c0_44] : memref<19x128xf32, #tpu.memory_space<vmem>>, vector<1x32xf32>
    %124 = vector.broadcast %123 : vector<1x32xf32> to vector<16x32xf32>
    %125 = arith.addf %122, %124 : vector<16x32xf32>
    %126 = arith.addf %105, %125 : vector<16x32xf32>
    %cst_45 = arith.constant dense<0.000000e+00> : vector<16xf32>
    %127 = vector.multi_reduction <add>, %126, %cst_45 [1] : vector<16x32xf32> to vector<16xf32>
    %128 = vector.shape_cast %127 : vector<16xf32> to vector<16x1xf32>
    %cst_46 = arith.constant 3.200000e+01 : f32
    %129 = vector.broadcast %cst_46 : f32 to vector<16x1xf32>
    %130 = arith.divf %128, %129 : vector<16x1xf32>
    %131 = vector.broadcast %130 : vector<16x1xf32> to vector<16x32xf32>
    %132 = arith.subf %126, %131 : vector<16x32xf32>
    %133 = arith.mulf %132, %132 : vector<16x32xf32>
    %cst_47 = arith.constant dense<0.000000e+00> : vector<16xf32>
    %134 = vector.multi_reduction <add>, %133, %cst_47 [1] : vector<16x32xf32> to vector<16xf32>
    %135 = vector.shape_cast %134 : vector<16xf32> to vector<16x1xf32>
    %cst_48 = arith.constant 3.200000e+01 : f32
    %136 = vector.broadcast %cst_48 : f32 to vector<16x1xf32>
    %137 = arith.divf %135, %136 : vector<16x1xf32>
    %138 = vector.broadcast %130 : vector<16x1xf32> to vector<16x32xf32>
    %139 = arith.subf %126, %138 : vector<16x32xf32>
    %cst_49 = arith.constant 9.99999996E-13 : f32
    %140 = vector.broadcast %cst_49 : f32 to vector<16x1xf32>
    %141 = arith.addf %137, %140 : vector<16x1xf32>
    %142 = math.rsqrt %141 : vector<16x1xf32>
    %143 = vector.broadcast %142 : vector<16x1xf32> to vector<16x32xf32>
    %144 = arith.mulf %139, %143 : vector<16x32xf32>
    %c8 = arith.constant 8 : index
    %c0_50 = arith.constant 0 : index
    %145 = vector.load %arg2[%c8, %c0_50] : memref<19x128xf32, #tpu.memory_space<vmem>>, vector<1x32xf32>
    %146 = vector.broadcast %145 : vector<1x32xf32> to vector<16x32xf32>
    %147 = arith.mulf %144, %146 : vector<16x32xf32>
    %c9 = arith.constant 9 : index
    %c0_51 = arith.constant 0 : index
    %148 = vector.load %arg2[%c9, %c0_51] : memref<19x128xf32, #tpu.memory_space<vmem>>, vector<1x32xf32>
    %149 = vector.broadcast %148 : vector<1x32xf32> to vector<16x32xf32>
    %150 = arith.addf %147, %149 : vector<16x32xf32>
    %c1_52 = arith.constant 1 : index
    %c0_53 = arith.constant 0 : index
    %c0_54 = arith.constant 0 : index
    %151 = vector.load %arg3[%c1_52, %c0_53, %c0_54] : memref<2x32x128xf32, #tpu.memory_space<vmem>>, vector<1x32x128xf32>
    %152 = vector.shape_cast %151 : vector<1x32x128xf32> to vector<32x128xf32>
    %c10 = arith.constant 10 : index
    %c0_55 = arith.constant 0 : index
    %153 = vector.load %arg2[%c10, %c0_55] : memref<19x128xf32, #tpu.memory_space<vmem>>, vector<1x96xf32>
    %154 = vector.extract_strided_slice %152 {offsets = [0, 0], sizes = [32, 96], strides = [1, 1]} : vector<32x128xf32> to vector<32x96xf32>
    %cst_56 = arith.constant dense<0.000000e+00> : vector<16x96xf32>
    %155 = tpu.matmul %150, %154, %cst_56 {dimension_numbers = #tpu.dot_dimension_numbers<[1], [0], [0], [1], [0, 0, 1, 1], [], []>} : vector<16x32xf32>, vector<32x96xf32>, vector<16x96xf32> -> vector<16x96xf32>
    %156 = vector.broadcast %153 : vector<1x96xf32> to vector<16x96xf32>
    %157 = arith.addf %155, %156 : vector<16x96xf32>
    %158 = vector.extract_strided_slice %157 {offsets = [0, 0], sizes = [16, 8], strides = [1, 1]} : vector<16x96xf32> to vector<16x8xf32>
    %159 = vector.extract_strided_slice %157 {offsets = [0, 8], sizes = [16, 8], strides = [1, 1]} : vector<16x96xf32> to vector<16x8xf32>
    %160 = vector.extract_strided_slice %157 {offsets = [0, 16], sizes = [16, 8], strides = [1, 1]} : vector<16x96xf32> to vector<16x8xf32>
    %161 = vector.extract_strided_slice %157 {offsets = [0, 24], sizes = [16, 8], strides = [1, 1]} : vector<16x96xf32> to vector<16x8xf32>
    %162 = tpu.concatenate %158, %159, %160, %161 in 0 : vector<16x8xf32>, vector<16x8xf32>, vector<16x8xf32>, vector<16x8xf32> -> vector<64x8xf32>
    %163 = vector.extract_strided_slice %157 {offsets = [0, 32], sizes = [16, 8], strides = [1, 1]} : vector<16x96xf32> to vector<16x8xf32>
    %164 = vector.extract_strided_slice %157 {offsets = [0, 40], sizes = [16, 8], strides = [1, 1]} : vector<16x96xf32> to vector<16x8xf32>
    %165 = vector.extract_strided_slice %157 {offsets = [0, 48], sizes = [16, 8], strides = [1, 1]} : vector<16x96xf32> to vector<16x8xf32>
    %166 = vector.extract_strided_slice %157 {offsets = [0, 56], sizes = [16, 8], strides = [1, 1]} : vector<16x96xf32> to vector<16x8xf32>
    %167 = tpu.concatenate %163, %164, %165, %166 in 0 : vector<16x8xf32>, vector<16x8xf32>, vector<16x8xf32>, vector<16x8xf32> -> vector<64x8xf32>
    %168 = vector.extract_strided_slice %157 {offsets = [0, 64], sizes = [16, 8], strides = [1, 1]} : vector<16x96xf32> to vector<16x8xf32>
    %169 = vector.extract_strided_slice %157 {offsets = [0, 72], sizes = [16, 8], strides = [1, 1]} : vector<16x96xf32> to vector<16x8xf32>
    %170 = vector.extract_strided_slice %157 {offsets = [0, 80], sizes = [16, 8], strides = [1, 1]} : vector<16x96xf32> to vector<16x8xf32>
    %171 = vector.extract_strided_slice %157 {offsets = [0, 88], sizes = [16, 8], strides = [1, 1]} : vector<16x96xf32> to vector<16x8xf32>
    %172 = tpu.concatenate %168, %169, %170, %171 in 0 : vector<16x8xf32>, vector<16x8xf32>, vector<16x8xf32>, vector<16x8xf32> -> vector<64x8xf32>
    %cst_57 = arith.constant dense<0.000000e+00> : vector<64x64xf32>
    %173 = tpu.matmul %162, %167, %cst_57 {dimension_numbers = #tpu.dot_dimension_numbers<[1], [1], [0], [0], [0, 0, 1, 0], [], []>} : vector<64x8xf32>, vector<64x8xf32>, vector<64x64xf32> -> vector<64x64xf32>
    %cst_58 = arith.constant 0.353553385 : f32
    %174 = vector.broadcast %cst_58 : f32 to vector<64x64xf32>
    %175 = arith.mulf %173, %174 : vector<64x64xf32>
    %176 = arith.addf %175, %1 : vector<64x64xf32>
    %cst_59 = arith.constant dense<0xFF800000> : vector<64xf32>
    %177 = vector.multi_reduction <maximumf>, %176, %cst_59 [1] : vector<64x64xf32> to vector<64xf32>
    %178 = vector.shape_cast %177 : vector<64xf32> to vector<64x1xf32>
    %179 = vector.broadcast %178 : vector<64x1xf32> to vector<64x64xf32>
    %180 = arith.subf %176, %179 : vector<64x64xf32>
    %181 = math.exp %180 : vector<64x64xf32>
    %cst_60 = arith.constant dense<0.000000e+00> : vector<64xf32>
    %182 = vector.multi_reduction <add>, %181, %cst_60 [1] : vector<64x64xf32> to vector<64xf32>
    %183 = vector.shape_cast %182 : vector<64xf32> to vector<64x1xf32>
    %184 = vector.broadcast %183 : vector<64x1xf32> to vector<64x64xf32>
    %185 = arith.divf %181, %184 : vector<64x64xf32>
    %cst_61 = arith.constant dense<0.000000e+00> : vector<64x8xf32>
    %186 = tpu.matmul %185, %172, %cst_61 {dimension_numbers = #tpu.dot_dimension_numbers<[1], [0], [0], [1], [0, 0, 1, 1], [], []>} : vector<64x64xf32>, vector<64x8xf32>, vector<64x8xf32> -> vector<64x8xf32>
    %187 = vector.extract_strided_slice %152 {offsets = [0, 96], sizes = [32, 32], strides = [1, 1]} : vector<32x128xf32> to vector<32x32xf32>
    %188 = vector.extract_strided_slice %186 {offsets = [0, 0], sizes = [16, 8], strides = [1, 1]} : vector<64x8xf32> to vector<16x8xf32>
    %189 = vector.extract_strided_slice %187 {offsets = [0, 0], sizes = [8, 32], strides = [1, 1]} : vector<32x32xf32> to vector<8x32xf32>
    %cst_62 = arith.constant dense<0.000000e+00> : vector<16x32xf32>
    %190 = tpu.matmul %188, %189, %cst_62 {dimension_numbers = #tpu.dot_dimension_numbers<[1], [0], [0], [1], [0, 0, 1, 1], [], []>} : vector<16x8xf32>, vector<8x32xf32>, vector<16x32xf32> -> vector<16x32xf32>
    %191 = vector.extract_strided_slice %186 {offsets = [16, 0], sizes = [16, 8], strides = [1, 1]} : vector<64x8xf32> to vector<16x8xf32>
    %192 = vector.extract_strided_slice %187 {offsets = [8, 0], sizes = [8, 32], strides = [1, 1]} : vector<32x32xf32> to vector<8x32xf32>
    %cst_63 = arith.constant dense<0.000000e+00> : vector<16x32xf32>
    %193 = tpu.matmul %191, %192, %cst_63 {dimension_numbers = #tpu.dot_dimension_numbers<[1], [0], [0], [1], [0, 0, 1, 1], [], []>} : vector<16x8xf32>, vector<8x32xf32>, vector<16x32xf32> -> vector<16x32xf32>
    %194 = arith.addf %190, %193 : vector<16x32xf32>
    %195 = vector.extract_strided_slice %186 {offsets = [32, 0], sizes = [16, 8], strides = [1, 1]} : vector<64x8xf32> to vector<16x8xf32>
    %196 = vector.extract_strided_slice %187 {offsets = [16, 0], sizes = [8, 32], strides = [1, 1]} : vector<32x32xf32> to vector<8x32xf32>
    %cst_64 = arith.constant dense<0.000000e+00> : vector<16x32xf32>
    %197 = tpu.matmul %195, %196, %cst_64 {dimension_numbers = #tpu.dot_dimension_numbers<[1], [0], [0], [1], [0, 0, 1, 1], [], []>} : vector<16x8xf32>, vector<8x32xf32>, vector<16x32xf32> -> vector<16x32xf32>
    %198 = arith.addf %194, %197 : vector<16x32xf32>
    %199 = vector.extract_strided_slice %186 {offsets = [48, 0], sizes = [16, 8], strides = [1, 1]} : vector<64x8xf32> to vector<16x8xf32>
    %200 = vector.extract_strided_slice %187 {offsets = [24, 0], sizes = [8, 32], strides = [1, 1]} : vector<32x32xf32> to vector<8x32xf32>
    %cst_65 = arith.constant dense<0.000000e+00> : vector<16x32xf32>
    %201 = tpu.matmul %199, %200, %cst_65 {dimension_numbers = #tpu.dot_dimension_numbers<[1], [0], [0], [1], [0, 0, 1, 1], [], []>} : vector<16x8xf32>, vector<8x32xf32>, vector<16x32xf32> -> vector<16x32xf32>
    %202 = arith.addf %198, %201 : vector<16x32xf32>
    %c11 = arith.constant 11 : index
    %c0_66 = arith.constant 0 : index
    %203 = vector.load %arg2[%c11, %c0_66] : memref<19x128xf32, #tpu.memory_space<vmem>>, vector<1x32xf32>
    %204 = vector.broadcast %203 : vector<1x32xf32> to vector<16x32xf32>
    %205 = arith.addf %202, %204 : vector<16x32xf32>
    %206 = arith.addf %150, %205 : vector<16x32xf32>
    %cst_67 = arith.constant dense<0.000000e+00> : vector<16xf32>
    %207 = vector.multi_reduction <add>, %206, %cst_67 [1] : vector<16x32xf32> to vector<16xf32>
    %208 = vector.shape_cast %207 : vector<16xf32> to vector<16x1xf32>
    %cst_68 = arith.constant 3.200000e+01 : f32
    %209 = vector.broadcast %cst_68 : f32 to vector<16x1xf32>
    %210 = arith.divf %208, %209 : vector<16x1xf32>
    %211 = vector.broadcast %210 : vector<16x1xf32> to vector<16x32xf32>
    %212 = arith.subf %206, %211 : vector<16x32xf32>
    %213 = arith.mulf %212, %212 : vector<16x32xf32>
    %cst_69 = arith.constant dense<0.000000e+00> : vector<16xf32>
    %214 = vector.multi_reduction <add>, %213, %cst_69 [1] : vector<16x32xf32> to vector<16xf32>
    %215 = vector.shape_cast %214 : vector<16xf32> to vector<16x1xf32>
    %cst_70 = arith.constant 3.200000e+01 : f32
    %216 = vector.broadcast %cst_70 : f32 to vector<16x1xf32>
    %217 = arith.divf %215, %216 : vector<16x1xf32>
    %218 = vector.broadcast %210 : vector<16x1xf32> to vector<16x32xf32>
    %219 = arith.subf %206, %218 : vector<16x32xf32>
    %cst_71 = arith.constant 9.99999996E-13 : f32
    %220 = vector.broadcast %cst_71 : f32 to vector<16x1xf32>
    %221 = arith.addf %217, %220 : vector<16x1xf32>
    %222 = math.rsqrt %221 : vector<16x1xf32>
    %223 = vector.broadcast %222 : vector<16x1xf32> to vector<16x32xf32>
    %224 = arith.mulf %219, %223 : vector<16x32xf32>
    %c12 = arith.constant 12 : index
    %c0_72 = arith.constant 0 : index
    %225 = vector.load %arg2[%c12, %c0_72] : memref<19x128xf32, #tpu.memory_space<vmem>>, vector<1x32xf32>
    %226 = vector.broadcast %225 : vector<1x32xf32> to vector<16x32xf32>
    %227 = arith.mulf %224, %226 : vector<16x32xf32>
    %c13 = arith.constant 13 : index
    %c0_73 = arith.constant 0 : index
    %228 = vector.load %arg2[%c13, %c0_73] : memref<19x128xf32, #tpu.memory_space<vmem>>, vector<1x32xf32>
    %229 = vector.broadcast %228 : vector<1x32xf32> to vector<16x32xf32>
    %230 = arith.addf %227, %229 : vector<16x32xf32>
    %c1_74 = arith.constant 1 : index
    %c0_75 = arith.constant 0 : index
    %c0_76 = arith.constant 0 : index
    %231 = vector.load %arg4[%c1_74, %c0_75, %c0_76] : memref<2x32x64xf32, #tpu.memory_space<vmem>>, vector<1x32x64xf32>
    %232 = vector.shape_cast %231 : vector<1x32x64xf32> to vector<32x64xf32>
    %cst_77 = arith.constant dense<0.000000e+00> : vector<16x64xf32>
    %233 = tpu.matmul %230, %232, %cst_77 {dimension_numbers = #tpu.dot_dimension_numbers<[1], [0], [0], [1], [0, 0, 1, 1], [], []>} : vector<16x32xf32>, vector<32x64xf32>, vector<16x64xf32> -> vector<16x64xf32>
    %c14 = arith.constant 14 : index
    %c0_78 = arith.constant 0 : index
    %234 = vector.load %arg2[%c14, %c0_78] : memref<19x128xf32, #tpu.memory_space<vmem>>, vector<1x64xf32>
    %235 = vector.broadcast %234 : vector<1x64xf32> to vector<16x64xf32>
    %236 = arith.addf %233, %235 : vector<16x64xf32>
    %cst_79 = arith.constant 5.000000e-01 : f32
    %237 = vector.broadcast %cst_79 : f32 to vector<16x64xf32>
    %238 = arith.mulf %237, %236 : vector<16x64xf32>
    %cst_80 = arith.constant 0.707106769 : f32
    %239 = vector.broadcast %cst_80 : f32 to vector<16x64xf32>
    %240 = arith.mulf %236, %239 : vector<16x64xf32>
    %241 = math.erf %240 : vector<16x64xf32>
    %cst_81 = arith.constant 1.000000e+00 : f32
    %242 = vector.broadcast %cst_81 : f32 to vector<16x64xf32>
    %243 = arith.addf %242, %241 : vector<16x64xf32>
    %244 = arith.mulf %238, %243 : vector<16x64xf32>
    %c1_82 = arith.constant 1 : index
    %c0_83 = arith.constant 0 : index
    %c0_84 = arith.constant 0 : index
    %245 = vector.load %arg5[%c1_82, %c0_83, %c0_84] : memref<2x64x32xf32, #tpu.memory_space<vmem>>, vector<1x64x32xf32>
    %246 = vector.shape_cast %245 : vector<1x64x32xf32> to vector<64x32xf32>
    %cst_85 = arith.constant dense<0.000000e+00> : vector<16x32xf32>
    %247 = tpu.matmul %244, %246, %cst_85 {dimension_numbers = #tpu.dot_dimension_numbers<[1], [0], [0], [1], [0, 0, 1, 1], [], []>} : vector<16x64xf32>, vector<64x32xf32>, vector<16x32xf32> -> vector<16x32xf32>
    %c15 = arith.constant 15 : index
    %c0_86 = arith.constant 0 : index
    %248 = vector.load %arg2[%c15, %c0_86] : memref<19x128xf32, #tpu.memory_space<vmem>>, vector<1x32xf32>
    %249 = vector.broadcast %248 : vector<1x32xf32> to vector<16x32xf32>
    %250 = arith.addf %247, %249 : vector<16x32xf32>
    %251 = arith.addf %230, %250 : vector<16x32xf32>
    %cst_87 = arith.constant dense<0.000000e+00> : vector<16xf32>
    %252 = vector.multi_reduction <add>, %251, %cst_87 [1] : vector<16x32xf32> to vector<16xf32>
    %253 = vector.shape_cast %252 : vector<16xf32> to vector<16x1xf32>
    %cst_88 = arith.constant 3.200000e+01 : f32
    %254 = vector.broadcast %cst_88 : f32 to vector<16x1xf32>
    %255 = arith.divf %253, %254 : vector<16x1xf32>
    %256 = vector.broadcast %255 : vector<16x1xf32> to vector<16x32xf32>
    %257 = arith.subf %251, %256 : vector<16x32xf32>
    %258 = arith.mulf %257, %257 : vector<16x32xf32>
    %cst_89 = arith.constant dense<0.000000e+00> : vector<16xf32>
    %259 = vector.multi_reduction <add>, %258, %cst_89 [1] : vector<16x32xf32> to vector<16xf32>
    %260 = vector.shape_cast %259 : vector<16xf32> to vector<16x1xf32>
    %cst_90 = arith.constant 3.200000e+01 : f32
    %261 = vector.broadcast %cst_90 : f32 to vector<16x1xf32>
    %262 = arith.divf %260, %261 : vector<16x1xf32>
    %263 = vector.broadcast %255 : vector<16x1xf32> to vector<16x32xf32>
    %264 = arith.subf %251, %263 : vector<16x32xf32>
    %cst_91 = arith.constant 9.99999996E-13 : f32
    %265 = vector.broadcast %cst_91 : f32 to vector<16x1xf32>
    %266 = arith.addf %262, %265 : vector<16x1xf32>
    %267 = math.rsqrt %266 : vector<16x1xf32>
    %268 = vector.broadcast %267 : vector<16x1xf32> to vector<16x32xf32>
    %269 = arith.mulf %264, %268 : vector<16x32xf32>
    %c16 = arith.constant 16 : index
    %c0_92 = arith.constant 0 : index
    %270 = vector.load %arg2[%c16, %c0_92] : memref<19x128xf32, #tpu.memory_space<vmem>>, vector<1x32xf32>
    %271 = vector.broadcast %270 : vector<1x32xf32> to vector<16x32xf32>
    %272 = arith.mulf %269, %271 : vector<16x32xf32>
    %c17 = arith.constant 17 : index
    %c0_93 = arith.constant 0 : index
    %273 = vector.load %arg2[%c17, %c0_93] : memref<19x128xf32, #tpu.memory_space<vmem>>, vector<1x32xf32>
    %274 = vector.broadcast %273 : vector<1x32xf32> to vector<16x32xf32>
    %275 = arith.addf %272, %274 : vector<16x32xf32>
    %c0_94 = arith.constant 0 : index
    %c0_95 = arith.constant 0 : index
    %c0_96 = arith.constant 0 : index
    %276 = vector.load %arg6[%c0_94, %c0_95, %c0_96] : memref<2x32x128xf32, #tpu.memory_space<vmem>>, vector<1x32x128xf32>
    %277 = vector.shape_cast %276 : vector<1x32x128xf32> to vector<32x128xf32>
    %cst_97 = arith.constant dense<0.000000e+00> : vector<16x128xf32>
    %278 = tpu.matmul %275, %277, %cst_97 {dimension_numbers = #tpu.dot_dimension_numbers<[1], [0], [0], [1], [0, 0, 1, 1], [], []>} : vector<16x32xf32>, vector<32x128xf32>, vector<16x128xf32> -> vector<16x128xf32>
    %c1_98 = arith.constant 1 : index
    %c0_99 = arith.constant 0 : index
    %c0_100 = arith.constant 0 : index
    %279 = vector.load %arg6[%c1_98, %c0_99, %c0_100] : memref<2x32x128xf32, #tpu.memory_space<vmem>>, vector<1x32x128xf32>
    %280 = vector.shape_cast %279 : vector<1x32x128xf32> to vector<32x128xf32>
    %cst_101 = arith.constant dense<0.000000e+00> : vector<16x128xf32>
    %281 = tpu.matmul %25, %280, %cst_101 {dimension_numbers = #tpu.dot_dimension_numbers<[1], [0], [0], [1], [0, 0, 1, 1], [], []>} : vector<16x32xf32>, vector<32x128xf32>, vector<16x128xf32> -> vector<16x128xf32>
    %282 = arith.addf %278, %281 : vector<16x128xf32>
    %c18 = arith.constant 18 : index
    %c0_102 = arith.constant 0 : index
    %283 = vector.load %arg2[%c18, %c0_102] : memref<19x128xf32, #tpu.memory_space<vmem>>, vector<1x128xf32>
    %284 = vector.broadcast %283 : vector<1x128xf32> to vector<16x128xf32>
    %285 = arith.addf %282, %284 : vector<16x128xf32>
    %c0_103 = arith.constant 0 : index
    %c0_104 = arith.constant 0 : index
    %286 = vector.load %arg7[%c0_103, %c0_104] : memref<16x128xf32, #tpu.memory_space<vmem>>, vector<16x128xf32>
    tpu.vector_store %arg7[%c0_103, %c0_104], %285 {strides = array<i32>} : memref<16x128xf32, #tpu.memory_space<vmem>>, vector<16x128xf32>,
    return
  }
}

</mosaic_0001>

<bundles_post_ra>
// kernel: tpu_custom_call.1
= control target key start
LH: loop header
LB: loop body
LE: loop exit
PB: predicated region body
PF: predicated region fallthrough
CT: control target
= control target key end

     0   :  { %12 = vsyncpa [#allocation3], 0  ;;  %s4173_s0 = inlined_call_operand.hbm [shape: f32[16,32], index: 0, kind: input, shape index: {}]   ;;  %s4174_s1 = inlined_call_operand.vmem [shape: f32[64,64], index: 1, kind: input, shape index: {}]   ;;  %s4175_s2 = inlined_call_operand.hbm [shape: f32[19,128], index: 2, kind: input, shape index: {}]   ;;  %s4176_s3 = inlined_call_operand.vmem [shape: f32[2,32,128], index: 3, kind: input, shape index: {}]   ;;  %s4177_s4 = inlined_call_operand.vmem [shape: f32[2,32,64], index: 4, kind: input, shape index: {}]   ;;  %s4178_s5 = inlined_call_operand.vmem [shape: f32[2,64,32], index: 5, kind: input, shape index: {}]   ;;  %s4179_s6 = inlined_call_operand.hbm [shape: f32[2,32,128], index: 6, kind: input, shape index: {}]   ;;  %s4180_s7 = inlined_call_operand.hbm [shape: f32[16,128], index: 7, kind: output, shape index: {}]  }
   0x1   :  { %13 = vsyncpa [#allocation6], 0 }
   0x2   :  { %14 = vsyncpa [#allocation4], 0  ;;  %s3570_s24 = smov [#allocation5]   ;;  %s3571_s26 = smov [#allocation2]  }
   0x3   :  { %s34_s25 = sshll.u32 %s3570_s24, 4  ;;  %s20_s27 = sshll.u32 %s3571_s26, 4  ;;  %s35_s25 = int_to_ptr.vmem [resolvable:$true] %s34_s25  ;;  %s3622_s27 = int_to_ptr.vmem [resolvable:$true] %s20_s27 }
   0x4   :  { %s3476_s30 = scalar_lea.hbm %s4175_s2, 384 }
   0x5   :  { %p3477_p0 = scmp.ne.s32.totalorder %s4175_s2, %s3476_s30  ;;  %p3480_p1 = scmp.lt.u32.totalorder %s3476_s30, %s4175_s2 }
   0x7   :  { %p3482_p2 = pnand %p3480_p1, %p3477_p0 }
   0x9   :  { %3485 = shalt.err (!%p3482_p2)
}
   0xa   :  { %s3486_s12 = scalar_lea.vmem %s35_s25, 384  ;;  %p3491_p4 = scmp.lt.s32.totalorder %s35_s25, %s35_s25 }
   0xb   :  { %p3487_p3 = scmp.ne.s32.totalorder %s35_s25, %s3486_s12  ;;  %p3492_p5 = scmp.lt.s32.totalorder %s3486_s12, %s3486_s12 }
   0xd   :  { %p3493_p6 = por %p3492_p5, %p3491_p4 }
   0xf   :  { %p3494_p7 = pnand %p3493_p6, %p3487_p3 }
  0x11   :  { %3497 = shalt.err (!%p3494_p7)
}
  0x12   :  { %s3572_s13 = smov 128   ;;  %s3573_s14 = smov 8  }
  0x13   :  { %40 = dma.hbm_to_vmem [thread:$0]  %s4175_s2, 384, %s35_s25, [#allocation6], %s3572_s13, %s3572_s13, %s3573_s14  }
  0x14   :  { %s3498_s19 = scalar_lea.hbm %s4173_s0, 256 }
  0x15   :  { %p3499_p8 = scmp.ne.s32.totalorder %s4173_s0, %s3498_s19  ;;  %p3502_p9 = scmp.lt.u32.totalorder %s3498_s19, %s4173_s0 }
  0x17   :  { %p3504_p10 = pnand %p3502_p9, %p3499_p8 }
  0x19   :  { %3507 = shalt.err (!%p3504_p10)
}
  0x1a   :  { %s3508_s24 = scalar_lea.vmem %s3622_s27, 256  ;;  %p3513_p12 = scmp.lt.s32.totalorder %s3622_s27, %s3622_s27 }
  0x1b   :  { %p3509_p11 = scmp.ne.s32.totalorder %s3622_s27, %s3508_s24  ;;  %p3514_p13 = scmp.lt.s32.totalorder %s3508_s24, %s3508_s24 }
  0x1d   :  { %p3515_p0 = por %p3514_p13, %p3513_p12 }
  0x1f   :  { %p3516_p1 = pnand %p3515_p0, %p3509_p11 }
  0x21   :  { %3519 = shalt.err (!%p3516_p1)
}
  0x22   :  { %26 = dma.hbm_to_vmem [thread:$0]  %s4173_s0, 256, %s3622_s27, [#allocation3], %s3572_s13, %s3572_s13, %s3573_s14  }
  0x23   :  { %s3574_s26 = smov [#allocation7]   ;;  %s3520_s8 = scalar_lea.hbm %s4179_s6, 1024 }
  0x24   :  { %s52_s28 = sshll.u32 %s3574_s26, 4  ;;  %p3521_p2 = scmp.ne.s32.totalorder %s4179_s6, %s3520_s8  ;;  %s53_s28 = int_to_ptr.vmem [resolvable:$true] %s52_s28 }
  0x25   :  { %p3524_p3 = scmp.lt.u32.totalorder %s3520_s8, %s4179_s6 }
  0x27   :  { %p3526_p4 = pnand %p3524_p3, %p3521_p2 }
  0x29   :  { %3529 = shalt.err (!%p3526_p4)
}
  0x2a   :  { %s3530_s15 = scalar_lea.vmem %s53_s28, 1024  ;;  %p3535_p6 = scmp.lt.s32.totalorder %s53_s28, %s53_s28 }
  0x2b   :  { %p3531_p5 = scmp.ne.s32.totalorder %s53_s28, %s3530_s15  ;;  %p3536_p7 = scmp.lt.s32.totalorder %s3530_s15, %s3530_s15 }
  0x2d   :  { %p3537_p8 = por %p3536_p7, %p3535_p6 }
  0x2f   :  { %p3538_p9 = pnand %p3537_p8, %p3531_p5 }
  0x31   :  { %3541 = shalt.err (!%p3538_p9)
}
  0x32   :  { %58 = dma.hbm_to_vmem [thread:$0]  %s4179_s6, 1024, %s53_s28, [#allocation6], %s3572_s13, %s3572_s13, %s3573_s14  }
  0x33   :  { %3564 = dma.done.wait [#allocation3], 256  }
  0x34   :  { %3565 = vsyncadd [#allocation3], 4294967040 }
  0x35   :  { %3566 = dma.done.wait [#allocation6], 1408  }
  0x36   :  { %3567 = vsyncadd [#allocation6], 4294965888  ;;  %vm78_vm0 = vcmask 261120   ;;  %v68_v0 = vld [vmem:[#allocation2] sm:$0xff]  ;;  %v69_v1 = vld [vmem:[#allocation2 + $0x8] sm:$0xff]  ;;  %vm240_vm1 = vcmask 64512  }
  0x37   :  { %v79_v2 = vsel %vm78_vm0, %v68_v0, 0.0  ;;  %v82_v3 = vsel %vm78_vm0, %v69_v1, 0.0  ;;  %v3681_v14 = vld [vmem:[%s4176_s3] sm:$0xff]  ;;  %v3686_v15 = vld [vmem:[%s4176_s3 + $0x8] sm:$0xff]  ;;  %v3691_v16 = vld [vmem:[%s4176_s3 + $0x10] sm:$0xff]  ;;  %s3575_s23 = smov 120  }
  0x38   :  { %80 = vadd.xlane.f32.xlu0 %v79_v2  ;;  %v3118_v17 = vpack.c.bf16 %v3686_v15, %v3681_v14  ;;  %v3698_v18 = vld [vmem:[%s4176_s3 + $0x18] sm:$0xff]  ;;  %v2603_v27 = vld [vmem:[#allocation5] ss:$0 sm:$0xff]  ;;  %v2604_v29 = vld [vmem:[#allocation5 + $0x1] ss:$0 sm:$0xff]  ;;  %s3576_s24 = smov 112  }
  0x39   :  { %v3122_v19 = vpack.c.bf16 %v3698_v18, %v3691_v16  ;;  %v2605_v36 = vld [vmem:[#allocation5 + $0x2] ss:$0 sm:$0xff]  ;;  %s3577_s2 = smov 104   ;;  %s3578_s25 = smov 96   ;;  %vm3731_vm2 = vmpackc.low %vm240_vm1, %vm240_vm1  ;;  %vm394_vm3 = vcmask 523264  }
  0x3a   :  { %3119 = vmatprep.subr.bf16.mxu0 %v3118_v17  ;;  %s3579_s19 = smov 64  }
  0x3b   :  { %3121 = vmatpush3.bf16.msra.mxu0 %v3118_v17 }
  0x3c   :  { %83 = vadd.xlane.f32.xlu0 %v82_v3  ;;  %3123 = vmatprep.subr.bf16.mxu0 %v3122_v19 }
  0x3f   :  { %3125 = vmatpush3.bf16.msra.mxu0 %v3122_v19  ;;  %v3778_v19 = vld [vmem:[%s4174_s1 + $0x10] sm:$0xff] }
  0xc5   :  { %v81_v4 = vpop.xlane.xlu0 %80 }
  0xc6   :  { %v86_v5 = vmul.f32 0.03125, %v81_v4 }
  0xc8   :  { %v88_v6 = vsub.f32 %v68_v0, %v86_v5  ;;  %v3765_v5 = vld [vmem:[%s4174_s1 + $0x8] sm:$0xff] }
  0xc9   :  { %v84_v7 = vpop.xlane.xlu0 %83 }
  0xca   :  { %v87_v8 = vmul.f32 0.03125, %v84_v7  ;;  %v90_v9 = vmul.f32 %v88_v6, %v88_v6 }
  0xcc   :  { %v89_v10 = vsub.f32 %v69_v1, %v87_v8  ;;  %v92_v11 = vsel %vm78_vm0, %v90_v9, 0.0  ;;  %v3770_v8 = vld [vmem:[%s4174_s1] sm:$0xff] }
  0xcd   :  { %93 = vadd.xlane.f32.xlu1 %v92_v11 }
  0xce   :  { %v91_v12 = vmul.f32 %v89_v10, %v89_v10 }
  0xd0   :  { %v95_v13 = vsel %vm78_vm0, %v91_v12, 0.0 }
  0xd1   :  { %96 = vadd.xlane.f32.xlu1 %v95_v13 }
 0x15a   :  { %v94_v20 = vpop.xlane.xlu1 %93 }
 0x15b   :  { %v98_v21 = vmul.f32 0.03125, %v94_v20 }
 0x15d   :  { %v100_v22 = vadd.f32 1e-12, %v98_v21 }
 0x15e   :  { %v97_v23 = vpop.xlane.xlu1 %96 }
 0x15f   :  { %3384 = vrsqrt.f32 %v100_v22  ;;  %v99_v24 = vmul.f32 0.03125, %v97_v23  ;;  %v3784_v23 = vld [vmem:[%s4174_s1 + $0x18] sm:$0xff] }
 0x161   :  { %v101_v25 = vadd.f32 1e-12, %v99_v24 }
 0x163   :  { %3386 = vrsqrt.f32 %v101_v25 }
 0x169   :  { %v3385_v26 = vpop.eup %3384 }
 0x16a   :  { %v104_v28 = vmul.f32 %v3385_v26, %v88_v6  ;;  %v3790_v26 = vld [vmem:[%s4174_s1 + $0x28] sm:$0xff] }
 0x16c   :  { %v111_v30 = vmul.f32 %v2603_v27, %v104_v28 }
 0x16d   :  { %v3387_v31 = vpop.eup %3386 }
 0x16e   :  { %v105_v32 = vmul.f32 %v3387_v31, %v89_v10  ;;  %v3702_v33 = vadd.f32 %v2604_v29, %v111_v30 }
 0x170   :  { %v112_v34 = vmul.f32 %v2603_v27, %v105_v32  ;;  %2870 = vmatprep.mubr.msk.f32.mxu0 %vm78_vm0, %v3702_v33 }
 0x172   :  { %v3706_v35 = vadd.f32 %v2604_v29, %v112_v34  ;;  %v3798_v34 = vld [vmem:[%s4174_s1 + $0x20] sm:$0xff] }
 0x174   :  { %2871 = vmatmul.mubr.msk.f32.vlgmr.msra.gmra.mrb[0].mxu0 %vm78_vm0, %v3706_v35 }
 0x247   :  { %v2872_v37 = vpop.f32.mrb[0].mxu0 }
 0x248   :  { %v207_v38 = vadd.f32 %v2872_v37, %v2605_v36  ;;  %v201_v39 = vpop.f32.mrb[1].mxu0  ;;  %v3803_v37 = vld [vmem:[%s4174_s1 + $0x38] sm:$0xff] }
 0x249   :  { %v202_v40 = vadd.f32 %v2605_v36, %v201_v39 }
 0x24a   :  { %214 = vrot.lane.b32.xlu1 %v207_v38, %s3575_s23 }
 0x24b   :  { %212 = vrot.lane.b32.xlu0 %v202_v40, %s3575_s23  ;;  %2889 = vmatprep.mubr.msk.f32.mxu1 %vm240_vm1, %v202_v40  ;;  %v3715_v41 = vpack.i.bf16 %v207_v38, %v202_v40 }
 0x24e   :  { %216 = vrot.lane.b32.xlu1 %v202_v40, %s3576_s24 }
 0x24f   :  { %220 = vrot.lane.b32.xlu0 %v202_v40, %s3577_s2 }
 0x252   :  { %218 = vrot.lane.b32.xlu1 %v207_v38, %s3576_s24 }
 0x253   :  { %3305 = vrot.lane.b32.xlu0 %v3715_v41, %s3578_s25 }
 0x256   :  { %222 = vrot.lane.b32.xlu1 %v207_v38, %s3577_s2 }
 0x2bc   :  { %v215_v42 = vpop.permute.xlu1 %214 }
 0x2bd   :  { %v213_v43 = vpop.permute.xlu0 %212 }
 0x2be   :  { %v3721_v44 = vpack.i.bf16 %v215_v42, %v213_v43 }
 0x2c0   :  { %v217_v45 = vpop.permute.xlu1 %216  ;;  %3310 = vrot.lane.b32.xlu1 %v3721_v44, %s3578_s25 }
 0x2c1   :  { %v221_v46 = vpop.permute.xlu0 %220 }
 0x2c4   :  { %v219_v47 = vpop.permute.xlu1 %218 }
 0x2c5   :  { %v3725_v48 = vpack.i.bf16 %v219_v47, %v217_v45  ;;  %v3306_v49 = vpop.permute.xlu0 %3305 }
 0x2c6   :  { %v3308_v50 = vunpack.i.h.bf16 %v3306_v49  ;;  %v3307_v51 = vunpack.i.l.bf16 %v3306_v49 }
 0x2c7   :  { %3315 = vrot.lane.b32.xlu0 %v3725_v48, %s3578_s25 }
 0x2c8   :  { %v223_v53 = vpop.permute.xlu1 %222  ;;  %v3126_v54 = vpack.c.bf16 %v3308_v50, %v3307_v51 }
 0x2c9   :  { %v3735_v55 = vpack.i.bf16 %v223_v53, %v221_v46 }
 0x2ca   :  { %3128 = vmatprep.subr.msk.bf16.mxu1 %vm3731_vm2, %v3126_v54 }
 0x2cb   :  { %3320 = vrot.lane.b32.xlu1 %v3735_v55, %s3578_s25  ;;  %3131 = vmatpush3.bf16.xpose.msk.msra.mxu1 %vm3731_vm2, %v3126_v54 }
 0x332   :  { %v3311_v56 = vpop.permute.xlu1 %3310 }
 0x333   :  { %v3313_v57 = vunpack.i.h.bf16 %v3311_v56  ;;  %v3312_v58 = vunpack.i.l.bf16 %v3311_v56 }
 0x335   :  { %v3132_v59 = vpack.c.bf16 %v3313_v57, %v3312_v58 }
 0x337   :  { %3134 = vmatprep.subr.msk.bf16.mxu1 %vm3731_vm2, %v3132_v59 }
 0x338   :  { %3137 = vmatpush3.bf16.xpose.msk.msra.mxu1 %vm3731_vm2, %v3132_v59 }
 0x339   :  { %v3316_v60 = vpop.permute.xlu0 %3315 }
 0x33a   :  { %v3318_v61 = vunpack.i.h.bf16 %v3316_v60  ;;  %v3317_v62 = vunpack.i.l.bf16 %v3316_v60 }
 0x33c   :  { %v3138_v63 = vpack.c.bf16 %v3318_v61, %v3317_v62 }
 0x33d   :  { %v3321_v0 = vpop.permute.xlu1 %3320 }
 0x33e   :  { %v3323_v1 = vunpack.i.h.bf16 %v3321_v0  ;;  %v3322_v2 = vunpack.i.l.bf16 %v3321_v0  ;;  %3140 = vmatprep.subr.msk.bf16.mxu1 %vm3731_vm2, %v3138_v63 }
 0x340   :  { %v3144_v3 = vpack.c.bf16 %v3323_v1, %v3322_v2  ;;  %3143 = vmatpush3.bf16.xpose.msk.msra.mxu1 %vm3731_vm2, %v3138_v63 }
 0x342   :  { %3146 = vmatprep.subr.msk.bf16.mxu1 %vm3731_vm2, %v3144_v3 }
 0x348   :  { %3149 = vmatpush3.bf16.xpose.msk.msra.mxu1 %vm3731_vm2, %v3144_v3 }
 0x34f   :  { %2890 = vmatmul.mubr.msk.f32.vlgmr.msra.gmra.mrb[0].mxu1 %vm240_vm1, %v207_v38 }
 0x350   :  { %2892 = vmatprep.mubr.msk.f32.mxu1 %vm240_vm1, %v213_v43 }
 0x353   :  { %2893 = vmatmul.mubr.msk.f32.gmra.mrb[2].mxu1 %vm240_vm1, %v215_v42 }
 0x354   :  { %2895 = vmatprep.mubr.msk.f32.mxu1 %vm240_vm1, %v217_v45 }
 0x357   :  { %2896 = vmatmul.mubr.msk.f32.gmra.mrb[4].mxu1 %vm240_vm1, %v219_v47  ;;  %v3816_v47 = vld [vmem:[%s4174_s1 + $0x30] sm:$0xff]  ;;  %s3580_s1 = smov 32  }
 0x358   :  { %2898 = vmatprep.mubr.msk.f32.mxu1 %vm240_vm1, %v221_v46 }
 0x35b   :  { %2899 = vmatmul.mubr.msk.f32.gmra.mrb[6].mxu1 %vm240_vm1, %v223_v53 }
 0x422   :  { %v2891_v4 = vpop.f32.mrb[0].mxu1 }
 0x423   :  { %v379_v6 = vmul.f32 0.35355338, %v2891_v4  ;;  %v339_v7 = vpop.f32.mrb[1].mxu1 }
 0x424   :  { %v378_v9 = vmul.f32 0.35355338, %v339_v7 }
 0x425   :  { %v387_v10 = vadd.f32 %v379_v6, %v3765_v5 }
 0x426   :  { %v2894_v11 = vpop.f32.mrb[2].mxu1  ;;  %v386_v12 = vadd.f32 %v378_v9, %v3770_v8 }
 0x427   :  { %v349_v13 = vpop.f32.mrb[3].mxu1  ;;  %v398_v17 = vsel %vm394_vm3, %v387_v10, -inf  ;;  %v381_v20 = vmul.f32 0.35355338, %v2894_v11 }
 0x428   :  { %v380_v21 = vmul.f32 0.35355338, %v349_v13  ;;  %399 = vmax.xlane.f32.xlu1 %v398_v17  ;;  %v395_v22 = vsel %vm394_vm3, %v386_v12, -inf }
 0x429   :  { %396 = vmax.xlane.f32.xlu0 %v395_v22  ;;  %v389_v31 = vadd.f32 %v381_v20, %v3784_v23 }
 0x42a   :  { %v2897_v24 = vpop.f32.mrb[4].mxu1  ;;  %v388_v25 = vadd.f32 %v380_v21, %v3778_v19 }
 0x42b   :  { %v383_v27 = vmul.f32 0.35355338, %v2897_v24  ;;  %v359_v28 = vpop.f32.mrb[5].mxu1  ;;  %v404_v43 = vsel %vm394_vm3, %v389_v31, -inf }
 0x42c   :  { %v382_v29 = vmul.f32 0.35355338, %v359_v28  ;;  %v401_v30 = vsel %vm394_vm3, %v388_v25, -inf }
 0x42d   :  { %402 = vmax.xlane.f32.xlu0 %v401_v30  ;;  %v391_v32 = vadd.f32 %v383_v27, %v3790_v26 }
 0x42e   :  { %v2900_v36 = vpop.f32.mrb[6].mxu1  ;;  %v3808_v45 = vadd.f32 %v382_v29, %v3798_v34 }
 0x42f   :  { %v385_v38 = vmul.f32 0.35355338, %v2900_v36  ;;  %v369_v39 = vpop.f32.mrb[7].mxu1  ;;  %v410_v40 = vsel %vm394_vm3, %v391_v32, -inf }
 0x430   :  { %v384_v42 = vmul.f32 0.35355338, %v369_v39  ;;  %411 = vmax.xlane.f32.xlu1 %v410_v40  ;;  %v407_v50 = vsel %vm394_vm3, %v3808_v45, -inf }
 0x431   :  { %405 = vmax.xlane.f32.xlu0 %v404_v43  ;;  %v3811_v46 = vadd.f32 %v385_v38, %v3803_v37 }
 0x432   :  { %v3823_v51 = vadd.f32 %v384_v42, %v3816_v47 }
 0x433   :  { %v416_v49 = vsel %vm394_vm3, %v3811_v46, -inf }
 0x434   :  { %417 = vmax.xlane.f32.xlu1 %v416_v49  ;;  %v413_v53 = vsel %vm394_vm3, %v3823_v51, -inf }
 0x435   :  { %408 = vmax.xlane.f32.xlu0 %v407_v50 }
 0x439   :  { %414 = vmax.xlane.f32.xlu0 %v413_v53 }
 0x445   :  { %3330 = vrot.lane.b32.xlu1 %v3721_v44, %s3579_s19 }
 0x44f   :  { %3325 = vrot.lane.b32.xlu0 %v3715_v41, %s3579_s19 }
 0x4b5   :  { %v400_v54 = vpop.xlane.xlu1 %399 }
 0x4b6   :  { %v420_v56 = vsub.f32 %v387_v10, %v400_v54  ;;  %v397_v57 = vpop.xlane.xlu0 %396 }
 0x4b7   :  { %v419_v58 = vsub.f32 %v386_v12, %v397_v57 }
 0x4b8   :  { %v429_v59 = vmul.f32 1.442695, %v420_v56 }
 0x4b9   :  { %v427_v60 = vmul.f32 1.442695, %v419_v58 }
 0x4ba   :  { %3388 = vpow2.f32 %v429_v59  ;;  %v403_v61 = vpop.xlane.xlu0 %402 }
 0x4bb   :  { %3390 = vpow2.f32 %v427_v60  ;;  %v421_v62 = vsub.f32 %v388_v25, %v403_v61 }
 0x4bd   :  { %v431_v63 = vmul.f32 1.442695, %v421_v62  ;;  %v412_v0 = vpop.xlane.xlu1 %411 }
 0x4be   :  { %v424_v1 = vsub.f32 %v391_v32, %v412_v0  ;;  %v406_v2 = vpop.xlane.xlu0 %405 }
 0x4bf   :  { %3392 = vpow2.f32 %v431_v63  ;;  %v422_v3 = vsub.f32 %v389_v31, %v406_v2 }
 0x4c0   :  { %v437_v44 = vmul.f32 1.442695, %v424_v1 }
 0x4c1   :  { %v433_v4 = vmul.f32 1.442695, %v422_v3  ;;  %v418_v6 = vpop.xlane.xlu1 %417 }
 0x4c2   :  { %3394 = vpow2.f32 %v437_v44  ;;  %v409_v41 = vpop.xlane.xlu0 %408  ;;  %v426_v42 = vsub.f32 %v3811_v46, %v418_v6 }
 0x4c3   :  { %3396 = vpow2.f32 %v433_v4  ;;  %v423_v38 = vsub.f32 %v3808_v45, %v409_v41 }
 0x4c4   :  { %v3831_v7 = vpop.eup %3388  ;;  %v441_v49 = vmul.f32 1.442695, %v426_v42  ;;  %v2640_v42 = vld [vmem:[#allocation5 + $0x3] ss:$0 sm:$0xff] }
 0x4c5   :  { %v3833_v9 = vpop.eup %3390  ;;  %v446_v10 = vsel %vm394_vm3, %v3831_v7, 0.0  ;;  %v3331_v17 = vpop.permute.xlu1 %3330  ;;  %v435_v39 = vmul.f32 1.442695, %v423_v38 }
 0x4c6   :  { %447 = vadd.xlane.f32.xlu1 %v446_v10  ;;  %v415_v11 = vpop.xlane.xlu0 %414  ;;  %v443_v12 = vsel %vm394_vm3, %v3833_v9, 0.0  ;;  %v3333_v27 = vunpack.i.h.bf16 %v3331_v17  ;;  %v3332_v28 = vunpack.i.l.bf16 %v3331_v17 }
 0x4c7   :  { %444 = vadd.xlane.f32.xlu0 %v443_v12  ;;  %v425_v40 = vsub.f32 %v3823_v51, %v415_v11  ;;  %3398 = vpow2.f32 %v435_v39 }
 0x4c8   :  { %v3154_v36 = vpack.c.bf16 %v3333_v27, %v3332_v28 }
 0x4c9   :  { %v3839_v13 = vpop.eup %3392  ;;  %v439_v43 = vmul.f32 1.442695, %v425_v40 }
 0x4ca   :  { %v3326_v20 = vpop.permute.xlu0 %3325  ;;  %v449_v21 = vsel %vm394_vm3, %v3839_v13, 0.0 }
 0x4cb   :  { %v3328_v22 = vunpack.i.h.bf16 %v3326_v20  ;;  %v3327_v24 = vunpack.i.l.bf16 %v3326_v20  ;;  %450 = vadd.xlane.f32.xlu0 %v449_v21  ;;  %3400 = vpow2.f32 %v439_v43 }
 0x4cc   :  { %v3843_v25 = vpop.eup %3394  ;;  %3402 = vpow2.f32 %v441_v49 }
 0x4cd   :  { %v3845_v29 = vpop.eup %3396  ;;  %v3150_v30 = vpack.c.bf16 %v3328_v22, %v3327_v24  ;;  %v458_v31 = vsel %vm394_vm3, %v3843_v25, 0.0 }
 0x4ce   :  { %v452_v32 = vsel %vm394_vm3, %v3845_v29, 0.0 }
 0x4cf   :  { %453 = vadd.xlane.f32.xlu1 %v452_v32  ;;  %459 = vadd.xlane.f32.xlu0 %v458_v31 }
 0x4d0   :  { %3151 = vmatprep.subr.bf16.mxu0 %v3150_v30 }
 0x4d1   :  { %3153 = vmatpush3.bf16.msra.mxu0 %v3150_v30  ;;  %v3399_v50 = vpop.eup %3398 }
 0x4d2   :  { %3155 = vmatprep.subr.bf16.mxu0 %v3154_v36  ;;  %v455_v53 = vsel %vm394_vm3, %v3399_v50, 0.0 }
 0x4d5   :  { %3157 = vmatpush3.bf16.msra.mxu0 %v3154_v36  ;;  %v3401_v54 = vpop.eup %3400 }
 0x4e0   :  { %3335 = vrot.lane.b32.xlu1 %v3725_v48, %s3579_s19  ;;  %v461_v48 = vsel %vm394_vm3, %v3401_v54, 0.0 }
 0x4e5   :  { %3340 = vrot.lane.b32.xlu0 %v3735_v55, %s3579_s19  ;;  %v3403_v55 = vpop.eup %3402 }
 0x4e6   :  { %v464_v45 = vsel %vm394_vm3, %v3403_v55, 0.0 }
 0x4e9   :  { %722 = vrot.lane.b32.xlu0 %v3681_v14, %s3580_s1 }
 0x4ed   :  { %807 = vrot.lane.b32.xlu0 %v3691_v16, %s3580_s1 }
 0x504   :  { %456 = vadd.xlane.f32.xlu1 %v455_v53 }
 0x508   :  { %462 = vadd.xlane.f32.xlu1 %v461_v48 }
 0x50c   :  { %465 = vadd.xlane.f32.xlu1 %v464_v45 }
 0x51d   :  { %637 = vrot.lane.b32.xlu1 %v3686_v15, %s3580_s1 }
 0x521   :  { %894 = vrot.lane.b32.xlu1 %v3698_v18, %s3580_s1 }
 0x553   :  { %v448_v51 = vpop.xlane.xlu1 %447 }
 0x554   :  { %v445_v46 = vpop.xlane.xlu0 %444 }
 0x555   :  { %3404 = vrcp.f32 %v445_v46 }
 0x556   :  { %3406 = vrcp.f32 %v448_v51 }
 0x558   :  { %v451_v56 = vpop.xlane.xlu0 %450 }
 0x559   :  { %3408 = vrcp.f32 %v451_v56 }
 0x55c   :  { %v454_v57 = vpop.xlane.xlu1 %453  ;;  %v460_v58 = vpop.xlane.xlu0 %459 }
 0x55d   :  { %3410 = vrcp.f32 %v454_v57 }
 0x55e   :  { %3412 = vrcp.f32 %v460_v58 }
 0x55f   :  { %v3405_v59 = vpop.eup %3404 }
 0x560   :  { %v3336_v60 = vpop.permute.xlu1 %3335  ;;  %v3341_v15 = vpop.permute.xlu0 %3340  ;;  %v468_v61 = vmul.f32 %v3405_v59, %v3833_v9 }
 0x561   :  { %v3338_v14 = vunpack.i.h.bf16 %v3336_v60  ;;  %v3337_v62 = vunpack.i.l.bf16 %v3336_v60  ;;  %v3343_v63 = vunpack.i.h.bf16 %v3341_v15  ;;  %v3342_v16 = vunpack.i.l.bf16 %v3341_v15  ;;  %v3407_v1 = vpop.eup %3406 }
 0x562   :  { %2917 = vmatprep.mubr.msk.f32.mxu0 %vm394_vm3, %v468_v61  ;;  %v470_v3 = vmul.f32 %v3407_v1, %v3831_v7 }
 0x563   :  { %v3158_v18 = vpack.c.bf16 %v3338_v14, %v3337_v62  ;;  %v3162_v0 = vpack.c.bf16 %v3343_v63, %v3342_v16  ;;  %v3409_v2 = vpop.eup %3408  ;;  %v1029_v62 = vld [vmem:[%s4177_s4] sm:$0xff]  ;;  %v1030_v63 = vld [vmem:[%s4177_s4 + $0x8] sm:$0xff] }
 0x564   :  { %v472_v4 = vmul.f32 %v3409_v2, %v3839_v13  ;;  %v723_v27 = vpop.permute.xlu0 %722  ;;  %v3166_v16 = vpack.c.bf16 %v1030_v63, %v1029_v62 }
 0x565   :  { %3159 = vmatprep.subr.bf16.mxu0 %v3158_v18 }
 0x566   :  { %3161 = vmatpush3.bf16.msra.mxu0 %v3158_v18  ;;  %3167 = vmatprep.subr.bf16.mxu1 %v3166_v16  ;;  %v1031_v18 = vld [vmem:[%s4177_s4 + $0x10] sm:$0xff] }
 0x567   :  { %3163 = vmatprep.subr.bf16.mxu0 %v3162_v0  ;;  %v3411_v44 = vpop.eup %3410  ;;  %3169 = vmatpush3.bf16.msra.mxu1 %v3166_v16 }
 0x568   :  { %v474_v41 = vmul.f32 %v3411_v44, %v3845_v29  ;;  %v3413_v11 = vpop.eup %3412  ;;  %v808_v31 = vpop.permute.xlu0 %807 }
 0x569   :  { %v478_v13 = vmul.f32 %v3413_v11, %v3843_v25 }
 0x56a   :  { %3165 = vmatpush3.bf16.msra.mxu0 %v3162_v0  ;;  %v1032_v0 = vld [vmem:[%s4177_s4 + $0x18] sm:$0xff] }
 0x56b   :  { %v3170_v1 = vpack.c.bf16 %v1032_v0, %v1031_v18 }
 0x56d   :  { %2918 = vmatmul.mubr.msk.f32.vlgmr.msra.gmra.mrb[2].mxu0 %vm394_vm3, %v470_v3  ;;  %3171 = vmatprep.subr.bf16.mxu1 %v3170_v1 }
 0x56e   :  { %2920 = vmatprep.mubr.msk.f32.mxu0 %vm394_vm3, %v472_v4  ;;  %3173 = vmatpush3.bf16.msra.mxu1 %v3170_v1 }
 0x571   :  { %2921 = vmatmul.mubr.msk.f32.gmra.mrb[4].mxu0 %vm394_vm3, %v474_v41 }
 0x591   :  { %v457_v6 = vpop.xlane.xlu1 %456 }
 0x592   :  { %3414 = vrcp.f32 %v457_v6 }
 0x595   :  { %v463_v9 = vpop.xlane.xlu1 %462 }
 0x596   :  { %3416 = vrcp.f32 %v463_v9 }
 0x599   :  { %v466_v10 = vpop.xlane.xlu1 %465 }
 0x59a   :  { %3418 = vrcp.f32 %v466_v10  ;;  %v2641_v10 = vld [vmem:[#allocation5 + $0x4] ss:$0 sm:$0xff] }
 0x59c   :  { %v3415_v7 = vpop.eup %3414 }
 0x59d   :  { %v476_v12 = vmul.f32 %v3415_v7, %v3399_v50  ;;  %v638_v24 = vpop.permute.xlu1 %637  ;;  %v2642_v7 = vld [vmem:[#allocation5 + $0x5] ss:$0 sm:$0xff] }
 0x59e   :  { %2929 = vmatprep.subr.mxu0 %v638_v24 }
 0x59f   :  { %2923 = vmatprep.mubr.msk.f32.mxu0 %vm394_vm3, %v476_v12  ;;  %2930 = vmatpush3.msra.mxu0 %v638_v24  ;;  %v1129_v24 = vld [vmem:[%s4178_s5] sm:$0xff] }
 0x5a0   :  { %v3417_v17 = vpop.eup %3416  ;;  %2924 = vmatmul.mubr.msk.f32.gmra.mrb[6].mxu0 %vm394_vm3, %v478_v13  ;;  %2934 = vmatprep.subr.mxu0 %v723_v27 }
 0x5a1   :  { %v480_v20 = vmul.f32 %v3417_v17, %v3401_v54  ;;  %v895_v32 = vpop.permute.xlu1 %894 }
 0x5a3   :  { %2926 = vmatprep.mubr.msk.f32.mxu0 %vm394_vm3, %v480_v20 }
 0x5a4   :  { %v3419_v21 = vpop.eup %3418 }
 0x5a5   :  { %v482_v22 = vmul.f32 %v3419_v21, %v3403_v55 }
 0x5a7   :  { %2927 = vmatmul.mubr.msk.f32.gmra.mrb[8].mxu0 %vm394_vm3, %v482_v22 }
 0x640   :  { %v2919_v28 = vpop.f32.mrb[2].mxu0 }
 0x641   :  { %v597_v29 = vpop.f32.mrb[3].mxu0 }
 0x644   :  { %v2922_v25 = vpop.f32.mrb[4].mxu0 }
 0x645   :  { %v607_v30 = vpop.f32.mrb[5].mxu0 }
 0x646   :  { %2931 = vmatprep.mubr.msk.f32.mxu0 %vm240_vm1, %v607_v30 }
 0x647   :  { %2932 = vmatmul.mubr.msk.f32.vlgmr.msra.gmra.mrb[10].mxu0 %vm240_vm1, %v2922_v25  ;;  %v1132_v25 = vld [vmem:[%s4178_s5 + $0x18] sm:$0xff] }
 0x648   :  { %2936 = vmatprep.mubr.msk.f32.mxu0 %vm240_vm1, %v597_v29  ;;  %2935 = vmatpush3.msra.mxu0 %v723_v27  ;;  %v1130_v27 = vld [vmem:[%s4178_s5 + $0x8] sm:$0xff]  ;;  %v1131_v29 = vld [vmem:[%s4178_s5 + $0x10] sm:$0xff] }
 0x649   :  { %2939 = vmatprep.subr.mxu0 %v808_v31  ;;  %v3178_v30 = vpack.c.bf16 %v1132_v25, %v1131_v29 }
 0x64f   :  { %2937 = vmatmul.mubr.msk.f32.vlgmr.msra.gmra.mrb[10].mxu0 %vm240_vm1, %v2919_v28  ;;  %v3174_v28 = vpack.c.bf16 %v1130_v27, %v1129_v24 }
 0x650   :  { %2940 = vmatpush3.msra.mxu0 %v808_v31  ;;  %v1133_v31 = vld [vmem:[%s4178_s5 + $0x20] sm:$0xff] }
 0x651   :  { %2944 = vmatprep.subr.mxu0 %v895_v32  ;;  %3175 = vmatprep.subr.bf16.mxu1 %v3174_v28 }
 0x673   :  { %v2925_v36 = vpop.f32.mrb[6].mxu0 }
 0x674   :  { %v617_v38 = vpop.f32.mrb[7].mxu0 }
 0x675   :  { %2941 = vmatprep.mubr.msk.f32.mxu0 %vm240_vm1, %v617_v38  ;;  %v1135_v38 = vld [vmem:[%s4178_s5 + $0x30] sm:$0xff] }
 0x676   :  { %2942 = vmatmul.mubr.msk.f32.vlgmr.msra.gmra.mrb[10].mxu0 %vm240_vm1, %v2925_v36 }
 0x677   :  { %2945 = vmatpush3.msra.mxu0 %v895_v32  ;;  %v1134_v32 = vld [vmem:[%s4178_s5 + $0x28] sm:$0xff] }
 0x678   :  { %v3182_v36 = vpack.c.bf16 %v1134_v32, %v1133_v31  ;;  %v2649_v31 = vld [vmem:[#allocation5 + $0x8] ss:$0 sm:$0xff] }
 0x67a   :  { %v2928_v39 = vpop.f32.mrb[8].mxu0 }
 0x67b   :  { %v627_v40 = vpop.f32.mrb[9].mxu0 }
 0x67c   :  { %2946 = vmatprep.mubr.msk.f32.mxu0 %vm240_vm1, %v627_v40 }
 0x67e   :  { %2947 = vmatmul.mubr.msk.f32.vlgmr.msra.gmra.mrb[10].mxu0 %vm240_vm1, %v2928_v39  ;;  %v1136_v39 = vld [vmem:[%s4178_s5 + $0x38] sm:$0xff] }
 0x67f   :  { %v3186_v40 = vpack.c.bf16 %v1136_v39, %v1135_v38 }
 0x751   :  { %v2948_v43 = vpop.f32.mrb[10].mxu0 }
 0x752   :  { %v986_v49 = vadd.f32 %v2948_v43, %v2640_v42  ;;  %v969_v50 = vpop.f32.mrb[11].mxu0 }
 0x753   :  { %v985_v53 = vadd.f32 %v2640_v42, %v969_v50  ;;  %v2643_v42 = vld [vmem:[#allocation5 + $0x6] ss:$0 sm:$0xff] }
 0x754   :  { %v988_v54 = vadd.f32 %v986_v49, %v3706_v35 }
 0x755   :  { %v987_v48 = vadd.f32 %v985_v53, %v3702_v33 }
 0x756   :  { %v992_v55 = vsel %vm78_vm0, %v988_v54, 0.0 }
 0x757   :  { %993 = vadd.xlane.f32.xlu1 %v992_v55  ;;  %v989_v45 = vsel %vm78_vm0, %v987_v48, 0.0 }
 0x758   :  { %990 = vadd.xlane.f32.xlu0 %v989_v45 }
 0x7e4   :  { %v994_v46 = vpop.xlane.xlu1 %993 }
 0x7e5   :  { %v996_v51 = vmul.f32 0.03125, %v994_v46  ;;  %v991_v56 = vpop.xlane.xlu0 %990 }
 0x7e6   :  { %v995_v57 = vmul.f32 0.03125, %v991_v56 }
 0x7e7   :  { %v998_v58 = vsub.f32 %v988_v54, %v996_v51 }
 0x7e8   :  { %v997_v59 = vsub.f32 %v987_v48, %v995_v57 }
 0x7e9   :  { %v1000_v61 = vmul.f32 %v998_v58, %v998_v58 }
 0x7ea   :  { %v999_v60 = vmul.f32 %v997_v59, %v997_v59 }
 0x7eb   :  { %v1004_v14 = vsel %vm78_vm0, %v1000_v61, 0.0 }
 0x7ec   :  { %v1001_v15 = vsel %vm78_vm0, %v999_v60, 0.0  ;;  %v2646_v60 = vld [vmem:[#allocation5 + $0x7] ss:$0 sm:$0xff] }
 0x7ed   :  { %1002 = vadd.xlane.f32.xlu0 %v1001_v15 }
 0x7f1   :  { %1005 = vadd.xlane.f32.xlu0 %v1004_v14 }
 0x87a   :  { %v1003_v2 = vpop.xlane.xlu0 %1002 }
 0x87b   :  { %v1007_v3 = vmul.f32 0.03125, %v1003_v2 }
 0x87d   :  { %v1009_v44 = vadd.f32 1e-12, %v1007_v3 }
 0x87e   :  { %v1006_v4 = vpop.xlane.xlu0 %1005 }
 0x87f   :  { %3420 = vrsqrt.f32 %v1009_v44  ;;  %v1008_v41 = vmul.f32 0.03125, %v1006_v4 }
 0x881   :  { %v1010_v6 = vadd.f32 1e-12, %v1008_v41 }
 0x883   :  { %3422 = vrsqrt.f32 %v1010_v6 }
 0x889   :  { %v3421_v9 = vpop.eup %3420 }
 0x88a   :  { %v1013_v11 = vmul.f32 %v3421_v9, %v997_v59 }
 0x88c   :  { %v1020_v12 = vmul.f32 %v2641_v10, %v1013_v11 }
 0x88d   :  { %v3423_v13 = vpop.eup %3422 }
 0x88e   :  { %v1014_v17 = vmul.f32 %v3423_v13, %v998_v58  ;;  %v1027_v20 = vadd.f32 %v2642_v7, %v1020_v12  ;;  %v3948_v12 = vld [vmem:[%s4176_s3 + $0x28] sm:$0xff] }
 0x890   :  { %v1021_v21 = vmul.f32 %v2641_v10, %v1014_v17  ;;  %2957 = vmatprep.mubr.msk.f32.mxu1 %vm78_vm0, %v1027_v20  ;;  %v3955_v17 = vld [vmem:[%s4176_s3 + $0x30] sm:$0xff] }
 0x892   :  { %v1028_v22 = vadd.f32 %v2642_v7, %v1021_v21  ;;  %v3943_v7 = vld [vmem:[%s4176_s3 + $0x20] sm:$0xff] }
 0x893   :  { %v3190_v13 = vpack.c.bf16 %v3948_v12, %v3943_v7 }
 0x894   :  { %2958 = vmatmul.mubr.msk.f32.vlgmr.msra.gmra.mrb[8].mxu1 %vm78_vm0, %v1028_v22 }
 0x895   :  { %3177 = vmatpush3.bf16.msra.mxu1 %v3174_v28  ;;  %3191 = vmatprep.subr.bf16.mxu0 %v3190_v13 }
 0x896   :  { %3179 = vmatprep.subr.bf16.mxu1 %v3178_v30  ;;  %3193 = vmatpush3.bf16.msra.mxu0 %v3190_v13 }
 0x899   :  { %3181 = vmatpush3.bf16.msra.mxu1 %v3178_v30 }
 0x89a   :  { %3183 = vmatprep.subr.bf16.mxu1 %v3182_v36 }
 0x89d   :  { %3185 = vmatpush3.bf16.msra.mxu1 %v3182_v36 }
 0x89e   :  { %3187 = vmatprep.subr.bf16.mxu1 %v3186_v40 }
 0x8a1   :  { %3189 = vmatpush3.bf16.msra.mxu1 %v3186_v40  ;;  %v2650_v40 = vld [vmem:[#allocation5 + $0x9] ss:$0 sm:$0xff] }
 0x967   :  { %v2959_v43 = vpop.f32.mrb[8].mxu1 }
 0x968   :  { %v1116_v49 = vadd.f32 %v2959_v43, %v2643_v42  ;;  %v1110_v50 = vpop.f32.mrb[9].mxu1 }
 0x969   :  { %v1111_v53 = vadd.f32 %v2643_v42, %v1110_v50  ;;  %v2655_v50 = vld [vmem:[#allocation5 + $0xa] ss:$0 sm:$0xff] }
 0x96a   :  { %v1122_v54 = vmul.f32 0.70710677, %v1116_v49  ;;  %v1120_v57 = vmul.f32 0.5, %v1116_v49 }
 0x96b   :  { %v1121_v48 = vmul.f32 0.70710677, %v1111_v53  ;;  %v1119_v51 = vmul.f32 0.5, %v1111_v53 }
 0x96c   :  { %3424 = verf.f32 %v1122_v54 }
 0x96d   :  { %3426 = verf.f32 %v1121_v48 }
 0x976   :  { %v3425_v55 = vpop.eup %3424 }
 0x977   :  { %v3427_v45 = vpop.eup %3426  ;;  %v1126_v46 = vadd.f32 1.0, %v3425_v55 }
 0x978   :  { %v1125_v56 = vadd.f32 1.0, %v3427_v45 }
 0x979   :  { %v1128_v59 = vmul.f32 %v1126_v46, %v1120_v57 }
 0x97a   :  { %v1127_v58 = vmul.f32 %v1125_v56, %v1119_v51 }
 0x97c   :  { %2976 = vmatprep.mubr.msk.f32.mxu1 %vm394_vm3, %v1127_v58 }
 0x97d   :  { %2977 = vmatmul.mubr.msk.f32.vlgmr.msra.gmra.mrb[10].mxu1 %vm394_vm3, %v1128_v59 }
 0xa50   :  { %v2978_v15 = vpop.f32.mrb[10].mxu1 }
 0xa51   :  { %v1220_v61 = vadd.f32 %v2978_v15, %v2646_v60  ;;  %v1214_v14 = vpop.f32.mrb[11].mxu1 }
 0xa52   :  { %v1215_v62 = vadd.f32 %v2646_v60, %v1214_v14 }
 0xa53   :  { %v1224_v63 = vadd.f32 %v1220_v61, %v1028_v22 }
 0xa54   :  { %v1223_v16 = vadd.f32 %v1215_v62, %v1027_v20  ;;  %v3960_v20 = vld [vmem:[%s4176_s3 + $0x38] sm:$0xff] }
 0xa55   :  { %v1228_v18 = vsel %vm78_vm0, %v1224_v63, 0.0  ;;  %v3194_v21 = vpack.c.bf16 %v3960_v20, %v3955_v17 }
 0xa56   :  { %1229 = vadd.xlane.f32.xlu1 %v1228_v18  ;;  %v1225_v0 = vsel %vm78_vm0, %v1223_v16, 0.0 }
 0xa57   :  { %1226 = vadd.xlane.f32.xlu0 %v1225_v0  ;;  %3195 = vmatprep.subr.bf16.mxu0 %v3194_v21 }
 0xa58   :  { %3197 = vmatpush3.bf16.msra.mxu0 %v3194_v21 }
 0xae3   :  { %v1230_v1 = vpop.xlane.xlu1 %1229 }
 0xae4   :  { %v1232_v2 = vmul.f32 0.03125, %v1230_v1  ;;  %v1227_v3 = vpop.xlane.xlu0 %1226 }
 0xae5   :  { %v1231_v44 = vmul.f32 0.03125, %v1227_v3 }
 0xae6   :  { %v1234_v4 = vsub.f32 %v1224_v63, %v1232_v2 }
 0xae7   :  { %v1233_v41 = vsub.f32 %v1223_v16, %v1231_v44 }
 0xae8   :  { %v1236_v6 = vmul.f32 %v1234_v4, %v1234_v4 }
 0xae9   :  { %v1235_v9 = vmul.f32 %v1233_v41, %v1233_v41 }
 0xaea   :  { %v1240_v10 = vsel %vm78_vm0, %v1236_v6, 0.0 }
 0xaeb   :  { %1241 = vadd.xlane.f32.xlu1 %v1240_v10  ;;  %v1237_v11 = vsel %vm78_vm0, %v1235_v9, 0.0 }
 0xaec   :  { %1238 = vadd.xlane.f32.xlu0 %v1237_v11 }
 0xb78   :  { %v1242_v22 = vpop.xlane.xlu1 %1241 }
 0xb79   :  { %v1244_v24 = vmul.f32 0.03125, %v1242_v22  ;;  %v1239_v27 = vpop.xlane.xlu0 %1238 }
 0xb7a   :  { %v1243_v28 = vmul.f32 0.03125, %v1239_v27 }
 0xb7b   :  { %v1246_v29 = vadd.f32 1e-12, %v1244_v24 }
 0xb7c   :  { %v1245_v25 = vadd.f32 1e-12, %v1243_v28 }
 0xb7d   :  { %3428 = vrsqrt.f32 %v1246_v29 }
 0xb7e   :  { %3430 = vrsqrt.f32 %v1245_v25 }
 0xb87   :  { %v3429_v30 = vpop.eup %3428 }
 0xb88   :  { %v3431_v32 = vpop.eup %3430  ;;  %v1250_v36 = vmul.f32 %v3429_v30, %v1234_v4 }
 0xb89   :  { %v1249_v38 = vmul.f32 %v3431_v32, %v1233_v41 }
 0xb8a   :  { %v1257_v39 = vmul.f32 %v2649_v31, %v1250_v36 }
 0xb8b   :  { %v1256_v42 = vmul.f32 %v2649_v31, %v1249_v38 }
 0xb8c   :  { %v3966_v49 = vadd.f32 %v2650_v40, %v1257_v39 }
 0xb8d   :  { %v3964_v43 = vadd.f32 %v2650_v40, %v1256_v42 }
 0xb8f   :  { %2987 = vmatprep.mubr.msk.f32.mxu0 %vm78_vm0, %v3964_v43 }
 0xb90   :  { %2988 = vmatmul.mubr.msk.f32.vlgmr.msra.gmra.mrb[12].mxu0 %vm78_vm0, %v3966_v49 }
 0xc63   :  { %v2989_v53 = vpop.f32.mrb[12].mxu0 }
 0xc64   :  { %v1353_v54 = vadd.f32 %v2989_v53, %v2655_v50  ;;  %v1347_v48 = vpop.f32.mrb[13].mxu0 }
 0xc65   :  { %v1348_v55 = vadd.f32 %v2655_v50, %v1347_v48 }
 0xc66   :  { %1360 = vrot.lane.b32.xlu1 %v1353_v54, %s3575_s23 }
 0xc67   :  { %1358 = vrot.lane.b32.xlu0 %v1348_v55, %s3575_s23  ;;  %3006 = vmatprep.mubr.msk.f32.mxu0 %vm240_vm1, %v1348_v55  ;;  %v3977_v45 = vpack.i.bf16 %v1353_v54, %v1348_v55 }
 0xc6a   :  { %1362 = vrot.lane.b32.xlu1 %v1348_v55, %s3576_s24 }
 0xc6b   :  { %1366 = vrot.lane.b32.xlu0 %v1348_v55, %s3577_s2 }
 0xc6e   :  { %1364 = vrot.lane.b32.xlu1 %v1353_v54, %s3576_s24 }
 0xc6f   :  { %3345 = vrot.lane.b32.xlu0 %v3977_v45, %s3578_s25 }
 0xc72   :  { %1368 = vrot.lane.b32.xlu1 %v1353_v54, %s3577_s2 }
 0xcd8   :  { %v1361_v46 = vpop.permute.xlu1 %1360 }
 0xcd9   :  { %v1359_v51 = vpop.permute.xlu0 %1358 }
 0xcda   :  { %v3983_v56 = vpack.i.bf16 %v1361_v46, %v1359_v51 }
 0xcdc   :  { %v1363_v57 = vpop.permute.xlu1 %1362  ;;  %3350 = vrot.lane.b32.xlu1 %v3983_v56, %s3578_s25 }
 0xcdd   :  { %v1367_v58 = vpop.permute.xlu0 %1366 }
 0xce0   :  { %v1365_v59 = vpop.permute.xlu1 %1364 }
 0xce1   :  { %v3987_v60 = vpack.i.bf16 %v1365_v59, %v1363_v57  ;;  %v3346_v15 = vpop.permute.xlu0 %3345 }
 0xce2   :  { %v3348_v61 = vunpack.i.h.bf16 %v3346_v15  ;;  %v3347_v14 = vunpack.i.l.bf16 %v3346_v15 }
 0xce3   :  { %3355 = vrot.lane.b32.xlu0 %v3987_v60, %s3578_s25 }
 0xce4   :  { %v3198_v62 = vpack.c.bf16 %v3348_v61, %v3347_v14  ;;  %v1369_v63 = vpop.permute.xlu1 %1368 }
 0xce5   :  { %v3991_v16 = vpack.i.bf16 %v1369_v63, %v1367_v58 }
 0xce6   :  { %3200 = vmatprep.subr.msk.bf16.mxu0 %vm3731_vm2, %v3198_v62 }
 0xce7   :  { %3360 = vrot.lane.b32.xlu1 %v3991_v16, %s3578_s25  ;;  %3203 = vmatpush3.bf16.xpose.msk.msra.mxu0 %vm3731_vm2, %v3198_v62 }
 0xd4e   :  { %v3351_v18 = vpop.permute.xlu1 %3350 }
 0xd4f   :  { %v3353_v0 = vunpack.i.h.bf16 %v3351_v18  ;;  %v3352_v1 = vunpack.i.l.bf16 %v3351_v18 }
 0xd51   :  { %v3204_v2 = vpack.c.bf16 %v3353_v0, %v3352_v1 }
 0xd53   :  { %3206 = vmatprep.subr.msk.bf16.mxu0 %vm3731_vm2, %v3204_v2 }
 0xd54   :  { %3209 = vmatpush3.bf16.xpose.msk.msra.mxu0 %vm3731_vm2, %v3204_v2 }
 0xd55   :  { %v3356_v3 = vpop.permute.xlu0 %3355 }
 0xd56   :  { %v3358_v44 = vunpack.i.h.bf16 %v3356_v3  ;;  %v3357_v4 = vunpack.i.l.bf16 %v3356_v3 }
 0xd58   :  { %v3210_v41 = vpack.c.bf16 %v3358_v44, %v3357_v4 }
 0xd59   :  { %v3361_v6 = vpop.permute.xlu1 %3360 }
 0xd5a   :  { %v3363_v9 = vunpack.i.h.bf16 %v3361_v6  ;;  %v3362_v10 = vunpack.i.l.bf16 %v3361_v6  ;;  %3212 = vmatprep.subr.msk.bf16.mxu0 %vm3731_vm2, %v3210_v41 }
 0xd5c   :  { %v3216_v11 = vpack.c.bf16 %v3363_v9, %v3362_v10  ;;  %3215 = vmatpush3.bf16.xpose.msk.msra.mxu0 %vm3731_vm2, %v3210_v41 }
 0xd5e   :  { %3218 = vmatprep.subr.msk.bf16.mxu0 %vm3731_vm2, %v3216_v11 }
 0xd64   :  { %3221 = vmatpush3.bf16.xpose.msk.msra.mxu0 %vm3731_vm2, %v3216_v11 }
 0xd6b   :  { %3007 = vmatmul.mubr.msk.f32.vlgmr.msra.gmra.mrb[14].mxu0 %vm240_vm1, %v1353_v54 }
 0xd6c   :  { %3009 = vmatprep.mubr.msk.f32.mxu0 %vm240_vm1, %v1359_v51 }
 0xd6f   :  { %3010 = vmatmul.mubr.msk.f32.gmra.mrb[16].mxu0 %vm240_vm1, %v1361_v46 }
 0xd70   :  { %3012 = vmatprep.mubr.msk.f32.mxu0 %vm240_vm1, %v1363_v57 }
 0xd73   :  { %3013 = vmatmul.mubr.msk.f32.gmra.mrb[18].mxu0 %vm240_vm1, %v1365_v59 }
 0xd74   :  { %3015 = vmatprep.mubr.msk.f32.mxu0 %vm240_vm1, %v1367_v58 }
 0xd77   :  { %3016 = vmatmul.mubr.msk.f32.gmra.mrb[20].mxu0 %vm240_vm1, %v1369_v63 }
 0xe3e   :  { %v3008_v13 = vpop.f32.mrb[14].mxu0 }
 0xe3f   :  { %v1524_v21 = vmul.f32 0.35355338, %v3008_v13  ;;  %v1484_v22 = vpop.f32.mrb[15].mxu0 }
 0xe40   :  { %v1523_v24 = vmul.f32 0.35355338, %v1484_v22 }
 0xe41   :  { %v1532_v52 = vadd.f32 %v1524_v21, %v3765_v5 }
 0xe42   :  { %v3011_v27 = vpop.f32.mrb[16].mxu0  ;;  %v1531_v28 = vadd.f32 %v1523_v24, %v3770_v8 }
 0xe43   :  { %v1494_v29 = vpop.f32.mrb[17].mxu0  ;;  %v1542_v25 = vsel %vm394_vm3, %v1532_v52, -inf  ;;  %v1526_v30 = vmul.f32 0.35355338, %v3011_v27 }
 0xe44   :  { %v1525_v31 = vmul.f32 0.35355338, %v1494_v29  ;;  %1543 = vmax.xlane.f32.xlu1 %v1542_v25  ;;  %v1539_v32 = vsel %vm394_vm3, %v1531_v28, -inf }
 0xe45   :  { %1540 = vmax.xlane.f32.xlu0 %v1539_v32  ;;  %v1534_v50 = vadd.f32 %v1526_v30, %v3784_v23 }
 0xe46   :  { %v3014_v36 = vpop.f32.mrb[18].mxu0  ;;  %v1533_v38 = vadd.f32 %v1525_v31, %v3778_v19 }
 0xe47   :  { %v1528_v39 = vmul.f32 0.35355338, %v3014_v36  ;;  %v1504_v40 = vpop.f32.mrb[19].mxu0  ;;  %v1548_v51 = vsel %vm394_vm3, %v1534_v50, -inf }
 0xe48   :  { %v1527_v42 = vmul.f32 0.35355338, %v1504_v40  ;;  %v1545_v5 = vsel %vm394_vm3, %v1533_v38, -inf }
 0xe49   :  { %1546 = vmax.xlane.f32.xlu0 %v1545_v5  ;;  %v1536_v8 = vadd.f32 %v1528_v39, %v3790_v26 }
 0xe4a   :  { %v3017_v53 = vpop.f32.mrb[20].mxu0  ;;  %v4029_v19 = vadd.f32 %v1527_v42, %v3798_v34 }
 0xe4b   :  { %v1530_v54 = vmul.f32 0.35355338, %v3017_v53  ;;  %v1514_v48 = vpop.f32.mrb[21].mxu0  ;;  %v1554_v55 = vsel %vm394_vm3, %v1536_v8, -inf }
 0xe4c   :  { %v1529_v46 = vmul.f32 0.35355338, %v1514_v48  ;;  %1555 = vmax.xlane.f32.xlu1 %v1554_v55  ;;  %v1551_v26 = vsel %vm394_vm3, %v4029_v19, -inf }
 0xe4d   :  { %1549 = vmax.xlane.f32.xlu0 %v1548_v51  ;;  %v4032_v57 = vadd.f32 %v1530_v54, %v3803_v37 }
 0xe4e   :  { %v4039_v58 = vadd.f32 %v1529_v46, %v3816_v47 }
 0xe4f   :  { %v1560_v23 = vsel %vm394_vm3, %v4032_v57, -inf }
 0xe50   :  { %1561 = vmax.xlane.f32.xlu1 %v1560_v23  ;;  %v1557_v59 = vsel %vm394_vm3, %v4039_v58, -inf }
 0xe51   :  { %1552 = vmax.xlane.f32.xlu0 %v1551_v26 }
 0xe55   :  { %1558 = vmax.xlane.f32.xlu0 %v1557_v59 }
 0xe61   :  { %3370 = vrot.lane.b32.xlu1 %v3983_v56, %s3579_s19 }
 0xe6b   :  { %3365 = vrot.lane.b32.xlu0 %v3977_v45, %s3579_s19 }
 0xed1   :  { %v1544_v34 = vpop.xlane.xlu1 %1543 }
 0xed2   :  { %v1564_v37 = vsub.f32 %v1532_v52, %v1544_v34  ;;  %v1541_v15 = vpop.xlane.xlu0 %1540 }
 0xed3   :  { %v1563_v61 = vsub.f32 %v1531_v28, %v1541_v15 }
 0xed4   :  { %v1573_v14 = vmul.f32 1.442695, %v1564_v37 }
 0xed5   :  { %v1571_v62 = vmul.f32 1.442695, %v1563_v61 }
 0xed6   :  { %3432 = vpow2.f32 %v1573_v14  ;;  %v1547_v47 = vpop.xlane.xlu0 %1546 }
 0xed7   :  { %3434 = vpow2.f32 %v1571_v62  ;;  %v1565_v63 = vsub.f32 %v1533_v38, %v1547_v47 }
 0xed9   :  { %v1575_v18 = vmul.f32 1.442695, %v1565_v63  ;;  %v1556_v0 = vpop.xlane.xlu1 %1555 }
 0xeda   :  { %v1568_v1 = vsub.f32 %v1536_v8, %v1556_v0  ;;  %v1550_v2 = vpop.xlane.xlu0 %1549 }
 0xedb   :  { %3436 = vpow2.f32 %v1575_v18  ;;  %v1566_v3 = vsub.f32 %v1534_v50, %v1550_v2 }
 0xedc   :  { %v1581_v56 = vmul.f32 1.442695, %v1568_v1 }
 0xedd   :  { %v1577_v44 = vmul.f32 1.442695, %v1566_v3  ;;  %v1562_v4 = vpop.xlane.xlu1 %1561 }
 0xede   :  { %3438 = vpow2.f32 %v1581_v56  ;;  %v1553_v45 = vpop.xlane.xlu0 %1552  ;;  %v1570_v5 = vsub.f32 %v4032_v57, %v1562_v4 }
 0xedf   :  { %3440 = vpow2.f32 %v1577_v44  ;;  %v1567_v39 = vsub.f32 %v4029_v19, %v1553_v45 }
 0xee0   :  { %v4047_v41 = vpop.eup %3432  ;;  %v1585_v8 = vmul.f32 1.442695, %v1570_v5 }
 0xee1   :  { %v3435_v6 = vpop.eup %3434  ;;  %v1590_v9 = vsel %vm394_vm3, %v4047_v41, 0.0  ;;  %v3371_v21 = vpop.permute.xlu1 %3370  ;;  %v1579_v40 = vmul.f32 1.442695, %v1567_v39 }
 0xee2   :  { %1591 = vadd.xlane.f32.xlu1 %v1590_v9  ;;  %v1559_v10 = vpop.xlane.xlu0 %1558  ;;  %v1587_v11 = vsel %vm394_vm3, %v3435_v6, 0.0  ;;  %v3373_v29 = vunpack.i.h.bf16 %v3371_v21  ;;  %v3372_v25 = vunpack.i.l.bf16 %v3371_v21 }
 0xee3   :  { %1588 = vadd.xlane.f32.xlu0 %v1587_v11  ;;  %v1569_v42 = vsub.f32 %v4039_v58, %v1559_v10  ;;  %3442 = vpow2.f32 %v1579_v40 }
 0xee4   :  { %v3226_v38 = vpack.c.bf16 %v3373_v29, %v3372_v25  ;;  %v2417_v29 = vld [vmem:[#allocation7 + $0x28] sm:$0xff] }
 0xee5   :  { %v4052_v13 = vpop.eup %3436  ;;  %v1583_v50 = vmul.f32 1.442695, %v1569_v42  ;;  %v2690_v42 = vld [vmem:[#allocation5 + $0xb] ss:$0 sm:$0xff] }
 0xee6   :  { %v3366_v22 = vpop.permute.xlu0 %3365  ;;  %v1593_v24 = vsel %vm394_vm3, %v4052_v13, 0.0 }
 0xee7   :  { %v3368_v52 = vunpack.i.h.bf16 %v3366_v22  ;;  %v3367_v27 = vunpack.i.l.bf16 %v3366_v22  ;;  %1594 = vadd.xlane.f32.xlu0 %v1593_v24  ;;  %3444 = vpow2.f32 %v1583_v50 }
 0xee8   :  { %v4056_v28 = vpop.eup %3438  ;;  %3446 = vpow2.f32 %v1585_v8 }
 0xee9   :  { %v4058_v30 = vpop.eup %3440  ;;  %v3222_v31 = vpack.c.bf16 %v3368_v52, %v3367_v27  ;;  %v1602_v32 = vsel %vm394_vm3, %v4056_v28, 0.0 }
 0xeea   :  { %v1596_v36 = vsel %vm394_vm3, %v4058_v30, 0.0 }
 0xeeb   :  { %1597 = vadd.xlane.f32.xlu1 %v1596_v36  ;;  %1603 = vadd.xlane.f32.xlu0 %v1602_v32  ;;  %v2418_v32 = vld [vmem:[#allocation7 + $0x30] sm:$0xff]  ;;  %v2419_v36 = vld [vmem:[#allocation7 + $0x38] sm:$0xff] }
 0xeec   :  { %3223 = vmatprep.subr.bf16.mxu1 %v3222_v31  ;;  %v3266_v40 = vpack.c.bf16 %v2419_v36, %v2418_v32 }
 0xeed   :  { %3225 = vmatpush3.bf16.msra.mxu1 %v3222_v31 }
 0xeee   :  { %3227 = vmatprep.subr.bf16.mxu1 %v3226_v38 }
 0xef1   :  { %3229 = vmatpush3.bf16.msra.mxu1 %v3226_v38 }
 0xefc   :  { %3375 = vrot.lane.b32.xlu1 %v3987_v60, %s3579_s19  ;;  %v3443_v60 = vpop.eup %3442 }
 0xefd   :  { %v3445_v53 = vpop.eup %3444 }
 0xf01   :  { %3380 = vrot.lane.b32.xlu0 %v3991_v16, %s3579_s19  ;;  %v1599_v16 = vsel %vm394_vm3, %v3443_v60, 0.0 }
 0xf05   :  { %1866 = vrot.lane.b32.xlu0 %v3943_v7, %s3580_s1  ;;  %v1605_v7 = vsel %vm394_vm3, %v3445_v53, 0.0 }
 0xf09   :  { %1951 = vrot.lane.b32.xlu0 %v3955_v17, %s3580_s1  ;;  %v3447_v17 = vpop.eup %3446 }
 0xf0a   :  { %v1608_v54 = vsel %vm394_vm3, %v3447_v17, 0.0 }
 0xf20   :  { %1600 = vadd.xlane.f32.xlu1 %v1599_v16 }
 0xf24   :  { %1606 = vadd.xlane.f32.xlu1 %v1605_v7 }
 0xf28   :  { %1609 = vadd.xlane.f32.xlu1 %v1608_v54 }
 0xf39   :  { %1781 = vrot.lane.b32.xlu1 %v3948_v12, %s3580_s1 }
 0xf3d   :  { %2038 = vrot.lane.b32.xlu1 %v3960_v20, %s3580_s1 }
 0xf6f   :  { %v1592_v55 = vpop.xlane.xlu1 %1591 }
 0xf70   :  { %v1589_v48 = vpop.xlane.xlu0 %1588 }
 0xf71   :  { %3448 = vrcp.f32 %v1589_v48 }
 0xf72   :  { %3450 = vrcp.f32 %v1592_v55 }
 0xf74   :  { %v1595_v46 = vpop.xlane.xlu0 %1594 }
 0xf75   :  { %3452 = vrcp.f32 %v1595_v46 }
 0xf78   :  { %v1598_v51 = vpop.xlane.xlu1 %1597  ;;  %v1604_v19 = vpop.xlane.xlu0 %1603 }
 0xf79   :  { %3454 = vrcp.f32 %v1598_v51 }
 0xf7a   :  { %3456 = vrcp.f32 %v1604_v19 }
 0xf7b   :  { %v3449_v57 = vpop.eup %3448 }
 0xf7c   :  { %v3376_v23 = vpop.permute.xlu1 %3375  ;;  %v3381_v26 = vpop.permute.xlu0 %3380  ;;  %v1612_v58 = vmul.f32 %v3449_v57, %v3435_v6 }
 0xf7d   :  { %v3378_v59 = vunpack.i.h.bf16 %v3376_v23  ;;  %v3377_v34 = vunpack.i.l.bf16 %v3376_v23  ;;  %v3383_v37 = vunpack.i.h.bf16 %v3381_v26  ;;  %v3382_v15 = vunpack.i.l.bf16 %v3381_v26  ;;  %v3451_v61 = vpop.eup %3450  ;;  %v2694_v23 = vld [vmem:[%s4177_s4 + $0x28] sm:$0xff] }
 0xf7e   :  { %3034 = vmatprep.mubr.msk.f32.mxu1 %vm394_vm3, %v1612_v58  ;;  %v1614_v62 = vmul.f32 %v3451_v61, %v4047_v41  ;;  %v2695_v58 = vld [vmem:[%s4177_s4 + $0x30] sm:$0xff] }
 0xf7f   :  { %v3230_v12 = vpack.c.bf16 %v3378_v59, %v3377_v34  ;;  %v3234_v20 = vpack.c.bf16 %v3383_v37, %v3382_v15  ;;  %v3453_v14 = vpop.eup %3452  ;;  %v2696_v59 = vld [vmem:[%s4177_s4 + $0x38] sm:$0xff] }
 0xf80   :  { %v1616_v63 = vmul.f32 %v3453_v14, %v4052_v13  ;;  %v1867_v11 = vpop.permute.xlu0 %1866  ;;  %v3242_v34 = vpack.c.bf16 %v2696_v59, %v2695_v58  ;;  %v2411_v59 = vld [vmem:[#allocation7] sm:$0xff] }
 0xf81   :  { %3231 = vmatprep.subr.bf16.mxu1 %v3230_v12 }
 0xf82   :  { %3233 = vmatpush3.bf16.msra.mxu1 %v3230_v12 }
 0xf83   :  { %3235 = vmatprep.subr.bf16.mxu1 %v3234_v20  ;;  %v3455_v47 = vpop.eup %3454 }
 0xf84   :  { %v1618_v18 = vmul.f32 %v3455_v47, %v4058_v30  ;;  %v3457_v3 = vpop.eup %3456  ;;  %v1952_v52 = vpop.permute.xlu0 %1951  ;;  %v2691_v47 = vld [vmem:[#allocation5 + $0xc] ss:$0 sm:$0xff] }
 0xf85   :  { %v1622_v45 = vmul.f32 %v3457_v3, %v4056_v28  ;;  %v2416_v28 = vld [vmem:[#allocation7 + $0x20] sm:$0xff] }
 0xf86   :  { %3237 = vmatpush3.bf16.msra.mxu1 %v3234_v20  ;;  %v3262_v31 = vpack.c.bf16 %v2417_v29, %v2416_v28 }
 0xf89   :  { %3035 = vmatmul.mubr.msk.f32.vlgmr.msra.gmra.mrb[12].mxu1 %vm394_vm3, %v1614_v62 }
 0xf8a   :  { %3037 = vmatprep.mubr.msk.f32.mxu1 %vm394_vm3, %v1616_v63 }
 0xf8d   :  { %3038 = vmatmul.mubr.msk.f32.gmra.mrb[14].mxu1 %vm394_vm3, %v1618_v18  ;;  %v2692_v18 = vld [vmem:[#allocation5 + $0xd] ss:$0 sm:$0xff] }
 0xfad   :  { %v1601_v0 = vpop.xlane.xlu1 %1600 }
 0xfae   :  { %3458 = vrcp.f32 %v1601_v0 }
 0xfb1   :  { %v1607_v1 = vpop.xlane.xlu1 %1606 }
 0xfb2   :  { %3460 = vrcp.f32 %v1607_v1 }
 0xfb5   :  { %v1610_v2 = vpop.xlane.xlu1 %1609 }
 0xfb6   :  { %3462 = vrcp.f32 %v1610_v2 }
 0xfb8   :  { %v3459_v56 = vpop.eup %3458 }
 0xfb9   :  { %v1620_v44 = vmul.f32 %v3459_v56, %v3443_v60  ;;  %v1782_v10 = vpop.permute.xlu1 %1781 }
 0xfba   :  { %3046 = vmatprep.subr.mxu1 %v1782_v10 }
 0xfbb   :  { %3040 = vmatprep.mubr.msk.f32.mxu1 %vm394_vm3, %v1620_v44  ;;  %3047 = vmatpush3.msra.mxu1 %v1782_v10 }
 0xfbc   :  { %v3461_v4 = vpop.eup %3460  ;;  %3041 = vmatmul.mubr.msk.f32.gmra.mrb[16].mxu1 %vm394_vm3, %v1622_v45  ;;  %3051 = vmatprep.subr.mxu1 %v1867_v11  ;;  %v2700_v45 = vld [vmem:[%s4178_s5 + $0x40] sm:$0xff] }
 0xfbd   :  { %v1624_v41 = vmul.f32 %v3461_v4, %v3445_v53  ;;  %v2039_v27 = vpop.permute.xlu1 %2038  ;;  %v2701_v4 = vld [vmem:[%s4178_s5 + $0x48] sm:$0xff] }
 0xfbf   :  { %3043 = vmatprep.mubr.msk.f32.mxu1 %vm394_vm3, %v1624_v41  ;;  %v3246_v41 = vpack.c.bf16 %v2701_v4, %v2700_v45  ;;  %v2712_v45 = vld [vmem:[#allocation5 + $0x11] ss:$0 sm:$0xff] }
 0xfc0   :  { %v3463_v6 = vpop.eup %3462 }
 0xfc1   :  { %v1626_v9 = vmul.f32 %v3463_v6, %v3447_v17  ;;  %v2702_v6 = vld [vmem:[%s4178_s5 + $0x50] sm:$0xff] }
 0xfc3   :  { %3044 = vmatmul.mubr.msk.f32.gmra.mrb[18].mxu1 %vm394_vm3, %v1626_v9  ;;  %v2703_v9 = vld [vmem:[%s4178_s5 + $0x58] sm:$0xff] }
 0xfc4   :  { %v3250_v10 = vpack.c.bf16 %v2703_v9, %v2702_v6  ;;  %v2717_v9 = vld [vmem:[#allocation5 + $0x12] ss:$0 sm:$0xff] }
0x105c   :  { %v3036_v13 = vpop.f32.mrb[12].mxu1 }
0x105d   :  { %v1741_v21 = vpop.f32.mrb[13].mxu1 }
0x1060   :  { %v3039_v22 = vpop.f32.mrb[14].mxu1 }
0x1061   :  { %v1751_v24 = vpop.f32.mrb[15].mxu1 }
0x1062   :  { %3048 = vmatprep.mubr.msk.f32.mxu1 %vm240_vm1, %v1751_v24  ;;  %v2707_v24 = vld [vmem:[%s4178_s5 + $0x78] sm:$0xff] }
0x1063   :  { %3049 = vmatmul.mubr.msk.f32.vlgmr.msra.gmra.mrb[20].mxu1 %vm240_vm1, %v3039_v22  ;;  %v2706_v22 = vld [vmem:[%s4178_s5 + $0x70] sm:$0xff] }
0x1064   :  { %3053 = vmatprep.mubr.msk.f32.mxu1 %vm240_vm1, %v1741_v21  ;;  %3052 = vmatpush3.msra.mxu1 %v1867_v11  ;;  %v2704_v11 = vld [vmem:[%s4178_s5 + $0x60] sm:$0xff] }
0x1065   :  { %3056 = vmatprep.subr.mxu1 %v1952_v52 }
0x106b   :  { %3054 = vmatmul.mubr.msk.f32.vlgmr.msra.gmra.mrb[20].mxu1 %vm240_vm1, %v3036_v13  ;;  %v2705_v13 = vld [vmem:[%s4178_s5 + $0x68] sm:$0xff]  ;;  %s3581_s5 = smov [#allocation8]  }
0x106c   :  { %3057 = vmatpush3.msra.mxu1 %v1952_v52  ;;  %v3254_v21 = vpack.c.bf16 %v2705_v13, %v2704_v11  ;;  %v3258_v52 = vpack.c.bf16 %v2707_v24, %v2706_v22  ;;  %s2590_s11 = sshll.u32 %s3581_s5, 4  ;;  %s2591_s11 = int_to_ptr.vmem [resolvable:$true] %s2590_s11 }
0x106d   :  { %3061 = vmatprep.subr.mxu1 %v2039_v27  ;;  %s3542_s12 = scalar_lea.vmem %s2591_s11, 256  ;;  %p3547_p11 = scmp.lt.s32.totalorder %s2591_s11, %s2591_s11 }
0x106e   :  { %p3543_p10 = scmp.ne.s32.totalorder %s2591_s11, %s3542_s12  ;;  %p3548_p12 = scmp.lt.s32.totalorder %s3542_s12, %s3542_s12 }
0x1070   :  { %p3549_p13 = por %p3548_p12, %p3547_p11 }
0x1072   :  { %p3550_p0 = pnand %p3549_p13, %p3543_p10 }
0x108f   :  { %v3042_v25 = vpop.f32.mrb[16].mxu1 }
0x1090   :  { %v1761_v30 = vpop.f32.mrb[17].mxu1 }
0x1091   :  { %3058 = vmatprep.mubr.msk.f32.mxu1 %vm240_vm1, %v1761_v30 }
0x1092   :  { %3059 = vmatmul.mubr.msk.f32.vlgmr.msra.gmra.mrb[20].mxu1 %vm240_vm1, %v3042_v25 }
0x1093   :  { %3062 = vmatpush3.msra.mxu1 %v2039_v27  ;;  %v2697_v27 = vld [vmem:[#allocation5 + $0xe] ss:$0 sm:$0xff] }
0x1094   :  { %3263 = vmatprep.subr.bf16.mxu1 %v3262_v31 }
0x1096   :  { %v3045_v38 = vpop.f32.mrb[18].mxu1 }
0x1097   :  { %v1771_v39 = vpop.f32.mrb[19].mxu1 }
0x1098   :  { %3063 = vmatprep.mubr.msk.f32.mxu1 %vm240_vm1, %v1771_v39 }
0x109a   :  { %3064 = vmatmul.mubr.msk.f32.vlgmr.msra.gmra.mrb[20].mxu1 %vm240_vm1, %v3045_v38 }
0x109b   :  { %3265 = vmatpush3.bf16.msra.mxu1 %v3262_v31  ;;  %3104 = vmatprep.mubr.msk.f32.mxu1 %vm78_vm0, %v3702_v33 }
0x109c   :  { %3267 = vmatprep.subr.bf16.mxu1 %v3266_v40 }
0x109f   :  { %3269 = vmatpush3.bf16.msra.mxu1 %v3266_v40 }
0x10a2   :  { %3105 = vmatmul.mubr.msk.f32.vlgmr.msra.gmra.mrb[22].mxu1 %vm78_vm0, %v3706_v35 }
0x116d   :  { %v3065_v5 = vpop.f32.mrb[20].mxu1 }
0x116e   :  { %v2130_v50 = vadd.f32 %v3065_v5, %v2690_v42  ;;  %v2113_v8 = vpop.f32.mrb[21].mxu1 }
0x116f   :  { %v2129_v60 = vadd.f32 %v2690_v42, %v2113_v8 }
0x1170   :  { %v2132_v16 = vadd.f32 %v2130_v50, %v3966_v49 }
0x1171   :  { %v2131_v53 = vadd.f32 %v2129_v60, %v3964_v43  ;;  %v2693_v43 = vld [vmem:[%s4177_s4 + $0x20] sm:$0xff]  ;;  %v2708_v60 = vld [vmem:[#allocation5 + $0xf] ss:$0 sm:$0xff] }
0x1172   :  { %v2136_v7 = vsel %vm78_vm0, %v2132_v16, 0.0  ;;  %v3238_v26 = vpack.c.bf16 %v2694_v23, %v2693_v43 }
0x1173   :  { %2137 = vadd.xlane.f32.xlu1 %v2136_v7  ;;  %v2133_v17 = vsel %vm78_vm0, %v2131_v53, 0.0 }
0x1174   :  { %2134 = vadd.xlane.f32.xlu0 %v2133_v17  ;;  %3239 = vmatprep.subr.bf16.mxu0 %v3238_v26 }
0x1175   :  { %3241 = vmatpush3.bf16.msra.mxu0 %v3238_v26 }
0x1176   :  { %3243 = vmatprep.subr.bf16.mxu0 %v3242_v34 }
0x1179   :  { %3245 = vmatpush3.bf16.msra.mxu0 %v3242_v34  ;;  %v2412_v34 = vld [vmem:[#allocation7 + $0x8] sm:$0xff] }
0x117a   :  { %3247 = vmatprep.subr.bf16.mxu0 %v3246_v41 }
0x1200   :  { %v2138_v33 = vpop.xlane.xlu1 %2137 }
0x1201   :  { %v2140_v54 = vmul.f32 0.03125, %v2138_v33  ;;  %v2135_v48 = vpop.xlane.xlu0 %2134 }
0x1202   :  { %v2139_v55 = vmul.f32 0.03125, %v2135_v48 }
0x1203   :  { %v2142_v35 = vsub.f32 %v2132_v16, %v2140_v54 }
0x1204   :  { %v2141_v46 = vsub.f32 %v2131_v53, %v2139_v55 }
0x1205   :  { %v2144_v57 = vmul.f32 %v2142_v35, %v2142_v35 }
0x1206   :  { %v2143_v51 = vmul.f32 %v2141_v46, %v2141_v46 }
0x1207   :  { %v2148_v49 = vsel %vm78_vm0, %v2144_v57, 0.0 }
0x1208   :  { %v2145_v19 = vsel %vm78_vm0, %v2143_v51, 0.0 }
0x1209   :  { %2146 = vadd.xlane.f32.xlu0 %v2145_v19 }
0x120d   :  { %2149 = vadd.xlane.f32.xlu0 %v2148_v49 }
0x1296   :  { %v2147_v37 = vpop.xlane.xlu0 %2146 }
0x1297   :  { %v2151_v15 = vmul.f32 0.03125, %v2147_v37  ;;  %v3270_v37 = vpack.c.bf16 %v2412_v34, %v2411_v59 }
0x1299   :  { %v2153_v12 = vadd.f32 1e-12, %v2151_v15  ;;  %v2413_v15 = vld [vmem:[#allocation7 + $0x10] sm:$0xff]  ;;  %3271 = vmatprep.subr.bf16.mxu1 %v3270_v37 }
0x129a   :  { %v2150_v20 = vpop.xlane.xlu0 %2149  ;;  %3273 = vmatpush3.bf16.msra.mxu1 %v3270_v37 }
0x129b   :  { %3464 = vrsqrt.f32 %v2153_v12  ;;  %v2152_v61 = vmul.f32 0.03125, %v2150_v20  ;;  %v2414_v12 = vld [vmem:[#allocation7 + $0x18] sm:$0xff] }
0x129c   :  { %v3274_v20 = vpack.c.bf16 %v2414_v12, %v2413_v15 }
0x129d   :  { %v2154_v14 = vadd.f32 1e-12, %v2152_v61 }
0x129e   :  { %3275 = vmatprep.subr.bf16.mxu1 %v3274_v20 }
0x129f   :  { %3466 = vrsqrt.f32 %v2154_v14  ;;  %3277 = vmatpush3.bf16.msra.mxu1 %v3274_v20 }
0x12a5   :  { %v3465_v62 = vpop.eup %3464 }
0x12a6   :  { %v2157_v63 = vmul.f32 %v3465_v62, %v2141_v46 }
0x12a8   :  { %v2164_v0 = vmul.f32 %v2691_v47, %v2157_v63 }
0x12a9   :  { %v3467_v1 = vpop.eup %3466 }
0x12aa   :  { %v2158_v2 = vmul.f32 %v3467_v1, %v2142_v35  ;;  %v2171_v3 = vadd.f32 %v2692_v18, %v2164_v0  ;;  %v2711_v1 = vld [vmem:[#allocation5 + $0x10] ss:$0 sm:$0xff] }
0x12ac   :  { %v2165_v56 = vmul.f32 %v2691_v47, %v2158_v2  ;;  %3074 = vmatprep.mubr.msk.f32.mxu0 %vm78_vm0, %v2171_v3 }
0x12ae   :  { %v2172_v44 = vadd.f32 %v2692_v18, %v2165_v56 }
0x12b0   :  { %3075 = vmatmul.mubr.msk.f32.vlgmr.msra.gmra.mrb[22].mxu0 %vm78_vm0, %v2172_v44 }
0x12b1   :  { %3249 = vmatpush3.bf16.msra.mxu0 %v3246_v41 }
0x12b2   :  { %3251 = vmatprep.subr.bf16.mxu0 %v3250_v10 }
0x12b5   :  { %3253 = vmatpush3.bf16.msra.mxu0 %v3250_v10 }
0x12b6   :  { %3255 = vmatprep.subr.bf16.mxu0 %v3254_v21 }
0x12b9   :  { %3257 = vmatpush3.bf16.msra.mxu0 %v3254_v21 }
0x12ba   :  { %3259 = vmatprep.subr.bf16.mxu0 %v3258_v52 }
0x12bd   :  { %3261 = vmatpush3.bf16.msra.mxu0 %v3258_v52 }
0x1383   :  { %v3076_v28 = vpop.f32.mrb[22].mxu0 }
0x1384   :  { %v2261_v29 = vadd.f32 %v3076_v28, %v2697_v27  ;;  %v2255_v25 = vpop.f32.mrb[23].mxu0 }
0x1385   :  { %v2256_v30 = vadd.f32 %v2697_v27, %v2255_v25 }
0x1386   :  { %v2267_v31 = vmul.f32 0.70710677, %v2261_v29  ;;  %v2265_v5 = vmul.f32 0.5, %v2261_v29 }
0x1387   :  { %v2266_v32 = vmul.f32 0.70710677, %v2256_v30  ;;  %v2264_v40 = vmul.f32 0.5, %v2256_v30 }
0x1388   :  { %3468 = verf.f32 %v2267_v31 }
0x1389   :  { %3470 = verf.f32 %v2266_v32 }
0x1392   :  { %v3469_v36 = vpop.eup %3468 }
0x1393   :  { %v3471_v38 = vpop.eup %3470  ;;  %v2271_v39 = vadd.f32 1.0, %v3469_v36 }
0x1394   :  { %v2270_v42 = vadd.f32 1.0, %v3471_v38 }
0x1395   :  { %v2273_v8 = vmul.f32 %v2271_v39, %v2265_v5 }
0x1396   :  { %v2272_v50 = vmul.f32 %v2270_v42, %v2264_v40 }
0x1398   :  { %3093 = vmatprep.mubr.msk.f32.mxu0 %vm394_vm3, %v2272_v50 }
0x1399   :  { %3094 = vmatmul.mubr.msk.f32.vlgmr.msra.gmra.mrb[24].mxu0 %vm394_vm3, %v2273_v8 }
0x146c   :  { %v3095_v16 = vpop.f32.mrb[24].mxu0 }
0x146d   :  { %v2366_v53 = vadd.f32 %v3095_v16, %v2708_v60  ;;  %v2360_v7 = vpop.f32.mrb[25].mxu0 }
0x146e   :  { %v2361_v17 = vadd.f32 %v2708_v60, %v2360_v7 }
0x146f   :  { %v2370_v33 = vadd.f32 %v2366_v53, %v2172_v44 }
0x1470   :  { %v2369_v54 = vadd.f32 %v2361_v17, %v2171_v3 }
0x1471   :  { %v2374_v48 = vsel %vm78_vm0, %v2370_v33, 0.0 }
0x1472   :  { %2375 = vadd.xlane.f32.xlu1 %v2374_v48  ;;  %v2371_v55 = vsel %vm78_vm0, %v2369_v54, 0.0 }
0x1473   :  { %2372 = vadd.xlane.f32.xlu0 %v2371_v55 }
0x14ff   :  { %v2376_v35 = vpop.xlane.xlu1 %2375 }
0x1500   :  { %v2378_v46 = vmul.f32 0.03125, %v2376_v35  ;;  %v2373_v51 = vpop.xlane.xlu0 %2372 }
0x1501   :  { %v2377_v19 = vmul.f32 0.03125, %v2373_v51 }
0x1502   :  { %v2380_v57 = vsub.f32 %v2370_v33, %v2378_v46 }
0x1503   :  { %v2379_v49 = vsub.f32 %v2369_v54, %v2377_v19 }
0x1504   :  { %v2382_v43 = vmul.f32 %v2380_v57, %v2380_v57 }
0x1505   :  { %v2381_v23 = vmul.f32 %v2379_v49, %v2379_v49 }
0x1506   :  { %v2386_v26 = vsel %vm78_vm0, %v2382_v43, 0.0 }
0x1507   :  { %2387 = vadd.xlane.f32.xlu1 %v2386_v26  ;;  %v2383_v58 = vsel %vm78_vm0, %v2381_v23, 0.0 }
0x1508   :  { %2384 = vadd.xlane.f32.xlu0 %v2383_v58 }
0x1594   :  { %v2388_v61 = vpop.xlane.xlu1 %2387 }
0x1595   :  { %v2390_v14 = vmul.f32 0.03125, %v2388_v61  ;;  %v2385_v62 = vpop.xlane.xlu0 %2384 }
0x1596   :  { %v2389_v47 = vmul.f32 0.03125, %v2385_v62 }
0x1597   :  { %v2392_v63 = vadd.f32 1e-12, %v2390_v14 }
0x1598   :  { %v2391_v18 = vadd.f32 1e-12, %v2389_v47 }
0x1599   :  { %3472 = vrsqrt.f32 %v2392_v63 }
0x159a   :  { %3474 = vrsqrt.f32 %v2391_v18 }
0x15a3   :  { %v3473_v0 = vpop.eup %3472 }
0x15a4   :  { %v3475_v2 = vpop.eup %3474  ;;  %v2396_v3 = vmul.f32 %v3473_v0, %v2380_v57 }
0x15a5   :  { %v2395_v56 = vmul.f32 %v3475_v2, %v2379_v49 }
0x15a6   :  { %v2403_v44 = vmul.f32 %v2711_v1, %v2396_v3 }
0x15a7   :  { %v2402_v4 = vmul.f32 %v2711_v1, %v2395_v56 }
0x15a8   :  { %v2410_v6 = vadd.f32 %v2712_v45, %v2403_v44 }
0x15a9   :  { %v2409_v41 = vadd.f32 %v2712_v45, %v2402_v4 }
0x15ab   :  { %3115 = vmatprep.mubr.msk.f32.mxu1 %vm78_vm0, %v2409_v41 }
0x15ac   :  { %3116 = vmatmul.mubr.msk.f32.vlgmr.msra.gmra.mrb[22].mxu1 %vm78_vm0, %v2410_v6 }
0x167f   :  { %v3117_v10 = vpop.f32.mrb[22].mxu1 }
0x1680   :  { %v2582_v11 = vadd.f32 %v3117_v10, %v2717_v9  ;;  %v2567_v13 = vpop.f32.mrb[23].mxu1 }
0x1681   :  { %v2581_v21 = vadd.f32 %v2717_v9, %v2567_v13 }
0x1682   :  { %2584 = vst [vmem:[#allocation8 + $0x8] sm:$0xff] %v2582_v11 }
0x1683   :  { %2583 = vst [vmem:[#allocation8] sm:$0xff] %v2581_v21 }
0x1684   :  { %3553 = shalt.err (!%p3550_p0)
}
0x1685   :  { %s3554_s23 = scalar_lea.hbm %s4180_s7, 256 }
0x1686   :  { %p3555_p1 = scmp.ne.s32.totalorder %s4180_s7, %s3554_s23  ;;  %p3558_p2 = scmp.lt.u32.totalorder %s3554_s23, %s4180_s7 }
0x1688   :  { %p3560_p3 = pnand %p3558_p2, %p3555_p1 }
0x168a   :  { %3563 = shalt.err (!%p3560_p3)
}
0x168b   :  { %2596 = dma.vmem_to_hbm [thread:$0]  %s2591_s11, 256, %s4180_s7, [#allocation4], %s3572_s13, %s3572_s13, %s3573_s14  }
0x168c   :  { %3568 = dma.done.wait [#allocation4], 256  }
0x168d   :  { %3569 = vsyncadd [#allocation4], 4294967040 }
0x168e   :  { %2600 = vsyncpa [#allocation3], 1 }
0x168f   :  { %2601 = vsyncpa [#allocation6], 1 }
0x1690   :  { %2602 = vsyncpa [#allocation4], 1 }

</bundles_post_ra>
